<compile_context>
chip_gen: v7x
topology: tpu7x:2x2x1
jax: 0.10.0
libtpu: 0.0.40
codegen_flags: <defaults>
</compile_context>

<pallas_src>
import functools
import math

import jax
import jax.numpy as jnp
from jax.experimental import pallas as pl
from jax.experimental.pallas import tpu as pltpu

# ----------------------------- config ---------------------------------------
NUM_VIEWS = 3
IMG_C, IMG_H, IMG_W = 3, 16, 16
PATCH = 8                                          # -> 2x2 = 4 patches
EMBED = 32
HEADS = 4
HEAD_DIM = EMBED // HEADS                          # 8
MLP_HIDDEN = 64
LN_EPS = 1e-6

N_PATCHES = (IMG_H // PATCH) * (IMG_W // PATCH)    # 4
SEQ = N_PATCHES + 1                                # 5 tokens (CLS + patches)
SEQ_PAD = 8                                        # pad to a sublane multiple
PATCH_FEAT = IMG_C * PATCH * PATCH                 # 192


# --------------------------- fused ViT kernel --------------------------------

def _layernorm(x, g, b):
    mu = jnp.mean(x, axis=-1, keepdims=True)
    var = jnp.mean((x - mu) ** 2, axis=-1, keepdims=True)
    return (x - mu) * jax.lax.rsqrt(var + LN_EPS) * g + b


def _vit_fused_kernel(patches_ref, base_ref, patch_w_ref,
                      ln1_g_ref, ln1_b_ref,
                      q_w_ref, k_w_ref, v_w_ref, q_b_ref, k_b_ref, v_b_ref,
                      proj_w_ref, proj_b_ref, ln2_g_ref, ln2_b_ref,
                      fc1_w_ref, fc1_b_ref, fc2_w_ref, fc2_b_ref,
                      lnf_g_ref, lnf_b_ref, o_ref, *, batch):
    """One grid step = one camera view.  Entire ViT forward, VMEM-resident."""
    f32 = jnp.float32
    B = batch
    BT = B * SEQ_PAD
    D = EMBED

    def mm(a, b):
        return jnp.dot(a, b, preferred_element_type=f32)

    # ---- patch embedding: Conv2d(k=stride=P) rewritten as one matmul.
    # CLS token, positional embedding and the conv bias are pre-composed into
    # `base` (padding rows are all-zero), so no in-kernel concatenation needed.
    x = mm(patches_ref[0], patch_w_ref[0]) + base_ref[0]            # [BT, D]

    # CLS-row selector (gather via matmul): sel[b, r] = 1 iff r == b*SEQ_PAD.
    br = jax.lax.broadcasted_iota(jnp.int32, (B, BT), 0)
    bc = jax.lax.broadcasted_iota(jnp.int32, (B, BT), 1)
    sel = (bc == br * SEQ_PAD).astype(f32)                           # [B, BT]

    # ---- attention block -----------------------------------------------------
    # This is the only token-mixing op and the final output is the CLS token,
    # so only the CLS query rows are live; keys/values still use all tokens.
    h = _layernorm(x, ln1_g_ref[0], ln1_b_ref[0])                    # [BT, D]
    k = mm(h, k_w_ref[0]) + k_b_ref[0]                               # [BT, D]
    v = mm(h, v_w_ref[0]) + v_b_ref[0]                               # [BT, D]
    h_cls = mm(sel, h)                                               # [B, D]
    q = mm(h_cls, q_w_ref[0]) + q_b_ref[0]                           # [B, D]

    # Logit mask: CLS query of sample b may only attend to the SEQ real
    # (non-padded) tokens of sample b.
    sp_shift = SEQ_PAD.bit_length() - 1            # SEQ_PAD is a power of two
    same_sample = (bc >> sp_shift) == br
    real_key = (bc & (SEQ_PAD - 1)) < SEQ
    logit_bias = jnp.where(same_sample & real_key, 0.0, -1e30).astype(f32)

    lane = jax.lax.broadcasted_iota(jnp.int32, (1, D), 1)
    scale = 1.0 / math.sqrt(HEAD_DIM)
    contract = (((1,), (1,)), ((), ()))            # A @ B.T, no batch dims

    attn = jnp.zeros((B, D), f32)
    for hh in range(HEADS):
        # Per-head lane mask replaces head slicing / transposes:
        #   (q*m) @ k.T == q_h @ k_h.T   and   p @ (v*m) writes the head output
        # into its own column block, so summing over heads == concat of heads.
        m = ((lane >= hh * HEAD_DIM) & (lane < (hh + 1) * HEAD_DIM)).astype(f32)
        s = jax.lax.dot_general(q * m, k, contract, preferred_element_type=f32)
        s = s * scale + logit_bias                                   # [B, BT]
        s = s - jnp.max(s, axis=-1, keepdims=True)
        p = jnp.exp(s)
        p = p * pl.reciprocal(jnp.sum(p, axis=-1, keepdims=True), approx=True)
        attn = attn + mm(p, v * m)                                   # [B, D]

    x_cls = mm(sel, x) + mm(attn, proj_w_ref[0]) + proj_b_ref[0]     # [B, D]

    # ---- MLP block (per-token, so only the CLS rows are computed) ------------
    h = _layernorm(x_cls, ln2_g_ref[0], ln2_b_ref[0])
    h = mm(h, fc1_w_ref[0]) + fc1_b_ref[0]
    # TODO(synk): timm's ViT default is exact (erf) GELU; tanh approximation here.
    h = jax.nn.gelu(h, approximate=True)
    x_cls = x_cls + mm(h, fc2_w_ref[0]) + fc2_b_ref[0]

    # ---- final LayerNorm + CLS feature write ----------------------------------
    o_ref[0] = _layernorm(x_cls, lnf_g_ref[0], lnf_b_ref[0])         # [B, D]


# ------------------------------ forward wrapper -------------------------------

@functools.partial(jax.jit, static_argnames=("share_params",))
def timm_encoder_forward(params, imgs, *, share_params=False):
    """params: stacked per-view dict; imgs: [V, B, C, H, W] -> [V*B, EMBED]."""
    V, B, C, H, W = imgs.shape
    Hp, Wp = H // PATCH, W // PATCH
    D = EMBED

    # ---- tiny, XLA-fused input / parameter preprocessing ---------------------
    # NCHW Conv2d(k=stride=P) as matmul: flatten patches in (C, ph, pw) order,
    # then pad so each sample occupies SEQ_PAD rows (row 0 = CLS slot).
    patches = (imgs.reshape(V, B, C, Hp, PATCH, Wp, PATCH)
                   .transpose(0, 1, 3, 5, 2, 4, 6)
                   .reshape(V, B, N_PATCHES, PATCH_FEAT))
    patches = jnp.pad(patches,
                      ((0, 0), (0, 0), (1, SEQ_PAD - 1 - N_PATCHES), (0, 0)))
    patches = patches.reshape(V, B * SEQ_PAD, PATCH_FEAT)

    Vp = params["cls"].shape[0]            # 1 if shared model, else V
    # Additive per-row base: CLS row = cls + pos[0]; patch row n = conv bias +
    # pos[1+n]; padding rows = 0.  Pure parameter composition, done outside.
    base = jnp.concatenate([
        params["cls"] + params["pos"][:, 0:1],                  # [Vp, 1, D]
        params["patch_b"] + params["pos"][:, 1:SEQ],            # [Vp, N, D]
        jnp.zeros((Vp, SEQ_PAD - SEQ, D), jnp.float32),         # padding rows
    ], axis=1)
    base = jnp.tile(base, (1, B, 1))                            # [Vp, B*SEQ_PAD, D]

    # Split the fused qkv projection so the kernel never lane-slices values.
    qkv_w, qkv_b = params["qkv_w"], params["qkv_b"]
    q_w, k_w, v_w = qkv_w[:, :, :D], qkv_w[:, :, D:2 * D], qkv_w[:, :, 2 * D:]
    q_b, k_b, v_b = qkv_b[:, :, :D], qkv_b[:, :, D:2 * D], qkv_b[:, :, 2 * D:]

    inputs = [patches, base, params["patch_w"],
              params["ln1_g"], params["ln1_b"],
              q_w, k_w, v_w, q_b, k_b, v_b,
              params["proj_w"], params["proj_b"],
              params["ln2_g"], params["ln2_b"],
              params["fc1_w"], params["fc1_b"],
              params["fc2_w"], params["fc2_b"],
              params["lnf_g"], params["lnf_b"]]

    view_map = lambda v: (v, 0, 0)
    param_map = (lambda v: (0, 0, 0)) if share_params else view_map
    in_specs = [pl.BlockSpec((1,) + patches.shape[1:], view_map)]
    in_specs += [pl.BlockSpec((1,) + a.shape[1:], param_map) for a in inputs[1:]]

    out = pl.pallas_call(
        functools.partial(_vit_fused_kernel, batch=B),
        out_shape=jax.ShapeDtypeStruct((V, B, D), jnp.float32),
        grid=(V,),
        in_specs=in_specs,
        out_specs=pl.BlockSpec((1, B, D), view_map),
        compiler_params=pltpu.CompilerParams(
            dimension_semantics=("parallel",)),
    )(*inputs)
    return out.reshape(V * B, D)                 # forward_loop: concat on dim 0


# ------------------------- params / encoder wrapper ---------------------------

def init_vit_params(key):
    """One small DINOv2-style ViT (the PyTorch `_build_model` is abstract)."""
    ks = jax.random.split(key, 8)
    D, Dh, PF = EMBED, MLP_HIDDEN, PATCH_FEAT
    std = 0.02
    return {
        "patch_w": jax.random.normal(ks[0], (PF, D), jnp.float32) * std,
        "patch_b": jnp.zeros((1, D), jnp.float32),
        "cls": jax.random.normal(ks[1], (1, D), jnp.float32) * std,
        "pos": jax.random.normal(ks[2], (SEQ, D), jnp.float32) * std,
        "ln1_g": jnp.ones((1, D), jnp.float32),
        "ln1_b": jnp.zeros((1, D), jnp.float32),
        "qkv_w": jax.random.normal(ks[3], (D, 3 * D), jnp.float32) * std,
        "qkv_b": jnp.zeros((1, 3 * D), jnp.float32),
        "proj_w": jax.random.normal(ks[4], (D, D), jnp.float32) * std,
        "proj_b": jnp.zeros((1, D), jnp.float32),
        "ln2_g": jnp.ones((1, D), jnp.float32),
        "ln2_b": jnp.zeros((1, D), jnp.float32),
        "fc1_w": jax.random.normal(ks[5], (D, Dh), jnp.float32) * std,
        "fc1_b": jnp.zeros((1, Dh), jnp.float32),
        "fc2_w": jax.random.normal(ks[6], (Dh, D), jnp.float32) * std,
        "fc2_b": jnp.zeros((1, D), jnp.float32),
        "lnf_g": jnp.ones((1, D), jnp.float32),
        "lnf_b": jnp.zeros((1, D), jnp.float32),
    }


class TimmEncoderPallas:
    """share_img_model=False -> forward_loop; True -> forward_batch."""

    def __init__(self, key, num_views=NUM_VIEWS, share_img_model=False):
        self.num_views = num_views
        self.share_img_model = share_img_model
        keys = jax.random.split(key, num_views)
        per_view = ([init_vit_params(keys[0])] if share_img_model
                    else [init_vit_params(k) for k in keys])
        # Stack per-view params on a leading axis so a single pallas_call with
        # grid=(num_views,) can select them via the BlockSpec index_map.
        self.params = jax.tree_util.tree_map(
            lambda *xs: jnp.stack(xs, axis=0), *per_view)

    def __call__(self, x_dict):
        # dict insertion order == per-view param order (same as PyTorch zip()).
        imgs = jnp.stack(list(x_dict.values()), axis=0)   # [V, B, C, H, W]
        return timm_encoder_forward(self.params, imgs,
                                    share_params=self.share_img_model)


# ----------------------------------- main -------------------------------------

if __name__ == "__main__":
    key = jax.random.PRNGKey(0)
    k_model, k_data = jax.random.split(key)

    encoder = TimmEncoderPallas(k_model, num_views=NUM_VIEWS,
                                share_img_model=False)

    B = 2
    dkeys = jax.random.split(k_data, NUM_VIEWS)
    x = {
        f"view{i}": jax.random.normal(
            dkeys[i], (B, IMG_C, IMG_H, IMG_W), jnp.float32)
        for i in range(NUM_VIEWS)
    }

    out = encoder(x)
    out = jax.block_until_ready(out)
    assert out.shape == (NUM_VIEWS * B, EMBED), out.shape
    assert bool(jnp.all(jnp.isfinite(out)))
    print("KERNEL_OK")
</pallas_src>

<mosaic_0001>
module attributes {stable_mosaic.version = 11 : i64} {
  func.func @_vit_fused_kernel(%arg0: i32, %arg1: memref<1x16x192xf32, #tpu.memory_space<vmem>>, %arg2: memref<1x16x32xf32, #tpu.memory_space<vmem>>, %arg3: memref<1x192x32xf32, #tpu.memory_space<vmem>>, %arg4: memref<1x1x32xf32, #tpu.memory_space<vmem>>, %arg5: memref<1x1x32xf32, #tpu.memory_space<vmem>>, %arg6: memref<1x32x32xf32, #tpu.memory_space<vmem>>, %arg7: memref<1x32x32xf32, #tpu.memory_space<vmem>>, %arg8: memref<1x32x32xf32, #tpu.memory_space<vmem>>, %arg9: memref<1x1x32xf32, #tpu.memory_space<vmem>>, %arg10: memref<1x1x32xf32, #tpu.memory_space<vmem>>, %arg11: memref<1x1x32xf32, #tpu.memory_space<vmem>>, %arg12: memref<1x32x32xf32, #tpu.memory_space<vmem>>, %arg13: memref<1x1x32xf32, #tpu.memory_space<vmem>>, %arg14: memref<1x1x32xf32, #tpu.memory_space<vmem>>, %arg15: memref<1x1x32xf32, #tpu.memory_space<vmem>>, %arg16: memref<1x32x64xf32, #tpu.memory_space<vmem>>, %arg17: memref<1x1x64xf32, #tpu.memory_space<vmem>>, %arg18: memref<1x64x32xf32, #tpu.memory_space<vmem>>, %arg19: memref<1x1x32xf32, #tpu.memory_space<vmem>>, %arg20: memref<1x1x32xf32, #tpu.memory_space<vmem>>, %arg21: memref<1x1x32xf32, #tpu.memory_space<vmem>>, %arg22: memref<1x2x32xf32, #tpu.memory_space<vmem>>) attributes {dimension_semantics = [#tpu.dimension_semantics<parallel>], iteration_bounds = array<i64: 3>, scalar_prefetch = 0 : i64, scratch_operands = 0 : i64, tpu.core_type = #tpu.core_type<tc>, window_params = [{transform_indices = @transform_0, window_bounds = array<i64: 1, 16, 192>}, {transform_indices = @transform_1, window_bounds = array<i64: 1, 16, 32>}, {transform_indices = @transform_2, window_bounds = array<i64: 1, 192, 32>}, {transform_indices = @transform_3, window_bounds = array<i64: 1, 1, 32>}, {transform_indices = @transform_4, window_bounds = array<i64: 1, 1, 32>}, {transform_indices = @transform_5, window_bounds = array<i64: 1, 32, 32>}, {transform_indices = @transform_6, window_bounds = array<i64: 1, 32, 32>}, {transform_indices = @transform_7, window_bounds = array<i64: 1, 32, 32>}, {transform_indices = @transform_8, window_bounds = array<i64: 1, 1, 32>}, {transform_indices = @transform_9, window_bounds = array<i64: 1, 1, 32>}, {transform_indices = @transform_10, window_bounds = array<i64: 1, 1, 32>}, {transform_indices = @transform_11, window_bounds = array<i64: 1, 32, 32>}, {transform_indices = @transform_12, window_bounds = array<i64: 1, 1, 32>}, {transform_indices = @transform_13, window_bounds = array<i64: 1, 1, 32>}, {transform_indices = @transform_14, window_bounds = array<i64: 1, 1, 32>}, {transform_indices = @transform_15, window_bounds = array<i64: 1, 32, 64>}, {transform_indices = @transform_16, window_bounds = array<i64: 1, 1, 64>}, {transform_indices = @transform_17, window_bounds = array<i64: 1, 64, 32>}, {transform_indices = @transform_18, window_bounds = array<i64: 1, 1, 32>}, {transform_indices = @transform_19, window_bounds = array<i64: 1, 1, 32>}, {transform_indices = @transform_20, window_bounds = array<i64: 1, 1, 32>}, {transform_indices = @transform_21, window_bounds = array<i64: 1, 2, 32>}]} {
    %c0 = arith.constant 0 : index
    %c0_0 = arith.constant 0 : index
    %c0_1 = arith.constant 0 : index
    %0 = vector.load %arg1[%c0, %c0_0, %c0_1] : memref<1x16x192xf32, #tpu.memory_space<vmem>>, vector<1x16x192xf32>
    %1 = vector.shape_cast %0 : vector<1x16x192xf32> to vector<16x192xf32>
    %c0_2 = arith.constant 0 : index
    %c0_3 = arith.constant 0 : index
    %c0_4 = arith.constant 0 : index
    %2 = vector.load %arg3[%c0_2, %c0_3, %c0_4] : memref<1x192x32xf32, #tpu.memory_space<vmem>>, vector<1x192x32xf32>
    %3 = vector.shape_cast %2 : vector<1x192x32xf32> to vector<192x32xf32>
    %cst = arith.constant dense<0.000000e+00> : vector<16x32xf32>
    %4 = tpu.matmul %1, %3, %cst {dimension_numbers = #tpu.dot_dimension_numbers<[1], [0], [0], [1], [0, 0, 1, 1], [], []>} : vector<16x192xf32>, vector<192x32xf32>, vector<16x32xf32> -> vector<16x32xf32>
    %c0_5 = arith.constant 0 : index
    %c0_6 = arith.constant 0 : index
    %c0_7 = arith.constant 0 : index
    %5 = vector.load %arg2[%c0_5, %c0_6, %c0_7] : memref<1x16x32xf32, #tpu.memory_space<vmem>>, vector<1x16x32xf32>
    %6 = vector.shape_cast %5 : vector<1x16x32xf32> to vector<16x32xf32>
    %7 = arith.addf %4, %6 : vector<16x32xf32>
    %8 = tpu.iota {dimensions = array<i32: 0>} : vector<2x16xi32>
    %9 = tpu.iota {dimensions = array<i32: 1>} : vector<2x16xi32>
    %c8_i32 = arith.constant 8 : i32
    %10 = vector.broadcast %c8_i32 : i32 to vector<2x16xi32>
    %11 = arith.muli %8, %10 : vector<2x16xi32>
    %12 = arith.cmpi eq, %9, %11 : vector<2x16xi32>
    %13 = arith.extui %12 : vector<2x16xi1> to vector<2x16xi32>
    %14 = arith.sitofp %13 : vector<2x16xi32> to vector<2x16xf32>
    %c0_8 = arith.constant 0 : index
    %c0_9 = arith.constant 0 : index
    %c0_10 = arith.constant 0 : index
    %15 = vector.load %arg4[%c0_8, %c0_9, %c0_10] : memref<1x1x32xf32, #tpu.memory_space<vmem>>, vector<1x1x32xf32>
    %16 = vector.shape_cast %15 : vector<1x1x32xf32> to vector<1x32xf32>
    %c0_11 = arith.constant 0 : index
    %c0_12 = arith.constant 0 : index
    %c0_13 = arith.constant 0 : index
    %17 = vector.load %arg5[%c0_11, %c0_12, %c0_13] : memref<1x1x32xf32, #tpu.memory_space<vmem>>, vector<1x1x32xf32>
    %18 = vector.shape_cast %17 : vector<1x1x32xf32> to vector<1x32xf32>
    %cst_14 = arith.constant dense<0.000000e+00> : vector<16xf32>
    %19 = vector.multi_reduction <add>, %7, %cst_14 [1] : vector<16x32xf32> to vector<16xf32>
    %20 = vector.shape_cast %19 : vector<16xf32> to vector<16x1xf32>
    %cst_15 = arith.constant 3.200000e+01 : f32
    %21 = vector.broadcast %cst_15 : f32 to vector<16x1xf32>
    %22 = arith.divf %20, %21 : vector<16x1xf32>
    %23 = vector.broadcast %22 : vector<16x1xf32> to vector<16x32xf32>
    %24 = arith.subf %7, %23 : vector<16x32xf32>
    %25 = arith.mulf %24, %24 : vector<16x32xf32>
    %cst_16 = arith.constant dense<0.000000e+00> : vector<16xf32>
    %26 = vector.multi_reduction <add>, %25, %cst_16 [1] : vector<16x32xf32> to vector<16xf32>
    %27 = vector.shape_cast %26 : vector<16xf32> to vector<16x1xf32>
    %cst_17 = arith.constant 3.200000e+01 : f32
    %28 = vector.broadcast %cst_17 : f32 to vector<16x1xf32>
    %29 = arith.divf %27, %28 : vector<16x1xf32>
    %30 = vector.broadcast %22 : vector<16x1xf32> to vector<16x32xf32>
    %31 = arith.subf %7, %30 : vector<16x32xf32>
    %cst_18 = arith.constant 9.99999997E-7 : f32
    %32 = vector.broadcast %cst_18 : f32 to vector<16x1xf32>
    %33 = arith.addf %29, %32 : vector<16x1xf32>
    %34 = math.rsqrt %33 : vector<16x1xf32>
    %35 = vector.broadcast %34 : vector<16x1xf32> to vector<16x32xf32>
    %36 = arith.mulf %31, %35 : vector<16x32xf32>
    %37 = vector.broadcast %16 : vector<1x32xf32> to vector<16x32xf32>
    %38 = arith.mulf %36, %37 : vector<16x32xf32>
    %39 = vector.broadcast %18 : vector<1x32xf32> to vector<16x32xf32>
    %40 = arith.addf %38, %39 : vector<16x32xf32>
    %c0_19 = arith.constant 0 : index
    %c0_20 = arith.constant 0 : index
    %c0_21 = arith.constant 0 : index
    %41 = vector.load %arg7[%c0_19, %c0_20, %c0_21] : memref<1x32x32xf32, #tpu.memory_space<vmem>>, vector<1x32x32xf32>
    %42 = vector.shape_cast %41 : vector<1x32x32xf32> to vector<32x32xf32>
    %cst_22 = arith.constant dense<0.000000e+00> : vector<16x32xf32>
    %43 = tpu.matmul %40, %42, %cst_22 {dimension_numbers = #tpu.dot_dimension_numbers<[1], [0], [0], [1], [0, 0, 1, 1], [], []>} : vector<16x32xf32>, vector<32x32xf32>, vector<16x32xf32> -> vector<16x32xf32>
    %c0_23 = arith.constant 0 : index
    %c0_24 = arith.constant 0 : index
    %c0_25 = arith.constant 0 : index
    %44 = vector.load %arg10[%c0_23, %c0_24, %c0_25] : memref<1x1x32xf32, #tpu.memory_space<vmem>>, vector<1x1x32xf32>
    %45 = vector.shape_cast %44 : vector<1x1x32xf32> to vector<1x32xf32>
    %46 = vector.broadcast %45 : vector<1x32xf32> to vector<16x32xf32>
    %47 = arith.addf %43, %46 : vector<16x32xf32>
    %c0_26 = arith.constant 0 : index
    %c0_27 = arith.constant 0 : index
    %c0_28 = arith.constant 0 : index
    %48 = vector.load %arg8[%c0_26, %c0_27, %c0_28] : memref<1x32x32xf32, #tpu.memory_space<vmem>>, vector<1x32x32xf32>
    %49 = vector.shape_cast %48 : vector<1x32x32xf32> to vector<32x32xf32>
    %cst_29 = arith.constant dense<0.000000e+00> : vector<16x32xf32>
    %50 = tpu.matmul %40, %49, %cst_29 {dimension_numbers = #tpu.dot_dimension_numbers<[1], [0], [0], [1], [0, 0, 1, 1], [], []>} : vector<16x32xf32>, vector<32x32xf32>, vector<16x32xf32> -> vector<16x32xf32>
    %c0_30 = arith.constant 0 : index
    %c0_31 = arith.constant 0 : index
    %c0_32 = arith.constant 0 : index
    %51 = vector.load %arg11[%c0_30, %c0_31, %c0_32] : memref<1x1x32xf32, #tpu.memory_space<vmem>>, vector<1x1x32xf32>
    %52 = vector.shape_cast %51 : vector<1x1x32xf32> to vector<1x32xf32>
    %53 = vector.broadcast %52 : vector<1x32xf32> to vector<16x32xf32>
    %54 = arith.addf %50, %53 : vector<16x32xf32>
    %cst_33 = arith.constant dense<0.000000e+00> : vector<2x32xf32>
    %55 = tpu.matmul %14, %40, %cst_33 {dimension_numbers = #tpu.dot_dimension_numbers<[1], [0], [0], [1], [0, 0, 1, 1], [], []>} : vector<2x16xf32>, vector<16x32xf32>, vector<2x32xf32> -> vector<2x32xf32>
    %c0_34 = arith.constant 0 : index
    %c0_35 = arith.constant 0 : index
    %c0_36 = arith.constant 0 : index
    %56 = vector.load %arg6[%c0_34, %c0_35, %c0_36] : memref<1x32x32xf32, #tpu.memory_space<vmem>>, vector<1x32x32xf32>
    %57 = vector.shape_cast %56 : vector<1x32x32xf32> to vector<32x32xf32>
    %cst_37 = arith.constant dense<0.000000e+00> : vector<2x32xf32>
    %58 = tpu.matmul %55, %57, %cst_37 {dimension_numbers = #tpu.dot_dimension_numbers<[1], [0], [0], [1], [0, 0, 1, 1], [], []>} : vector<2x32xf32>, vector<32x32xf32>, vector<2x32xf32> -> vector<2x32xf32>
    %c0_38 = arith.constant 0 : index
    %c0_39 = arith.constant 0 : index
    %c0_40 = arith.constant 0 : index
    %59 = vector.load %arg9[%c0_38, %c0_39, %c0_40] : memref<1x1x32xf32, #tpu.memory_space<vmem>>, vector<1x1x32xf32>
    %60 = vector.shape_cast %59 : vector<1x1x32xf32> to vector<1x32xf32>
    %61 = vector.broadcast %60 : vector<1x32xf32> to vector<2x32xf32>
    %62 = arith.addf %58, %61 : vector<2x32xf32>
    %c3_i32 = arith.constant 3 : i32
    %63 = vector.broadcast %c3_i32 : i32 to vector<2x16xi32>
    %64 = arith.shrsi %9, %63 : vector<2x16xi32>
    %65 = arith.cmpi eq, %64, %8 : vector<2x16xi32>
    %c7_i32 = arith.constant 7 : i32
    %66 = vector.broadcast %c7_i32 : i32 to vector<2x16xi32>
    %67 = arith.andi %9, %66 : vector<2x16xi32>
    %c5_i32 = arith.constant 5 : i32
    %68 = vector.broadcast %c5_i32 : i32 to vector<2x16xi32>
    %69 = arith.cmpi slt, %67, %68 : vector<2x16xi32>
    %70 = arith.andi %65, %69 : vector<2x16xi1>
    %cst_41 = arith.constant 0.000000e+00 : f32
    %cst_42 = arith.constant -1.000000e+30 : f32
    %71 = vector.broadcast %cst_41 : f32 to vector<2x16xf32>
    %72 = vector.broadcast %cst_42 : f32 to vector<2x16xf32>
    %73 = arith.select %70, %71, %72 : vector<2x16xi1>, vector<2x16xf32>
    %74 = tpu.iota {dimensions = array<i32: 1>} : vector<1x32xi32>
    %cst_43 = arith.constant 0.000000e+00 : f32
    %75 = vector.broadcast %cst_43 : f32 to vector<2x32xf32>
    %c0_i32 = arith.constant 0 : i32
    %76 = vector.broadcast %c0_i32 : i32 to vector<1x32xi32>
    %77 = arith.cmpi sge, %74, %76 : vector<1x32xi32>
    %c8_i32_44 = arith.constant 8 : i32
    %78 = vector.broadcast %c8_i32_44 : i32 to vector<1x32xi32>
    %79 = arith.cmpi slt, %74, %78 : vector<1x32xi32>
    %80 = arith.andi %77, %79 : vector<1x32xi1>
    %81 = arith.extui %80 : vector<1x32xi1> to vector<1x32xi32>
    %82 = arith.sitofp %81 : vector<1x32xi32> to vector<1x32xf32>
    %83 = vector.broadcast %82 : vector<1x32xf32> to vector<2x32xf32>
    %84 = arith.mulf %62, %83 : vector<2x32xf32>
    %cst_45 = arith.constant dense<0.000000e+00> : vector<2x16xf32>
    %85 = tpu.matmul %84, %47, %cst_45 {dimension_numbers = #tpu.dot_dimension_numbers<[1], [1], [0], [0], [0, 0, 1, 0], [], []>} : vector<2x32xf32>, vector<16x32xf32>, vector<2x16xf32> -> vector<2x16xf32>
    %cst_46 = arith.constant 0.353553385 : f32
    %86 = vector.broadcast %cst_46 : f32 to vector<2x16xf32>
    %87 = arith.mulf %85, %86 : vector<2x16xf32>
    %88 = arith.addf %87, %73 : vector<2x16xf32>
    %cst_47 = arith.constant dense<0xFF800000> : vector<2xf32>
    %89 = vector.multi_reduction <maximumf>, %88, %cst_47 [1] : vector<2x16xf32> to vector<2xf32>
    %90 = vector.shape_cast %89 : vector<2xf32> to vector<2x1xf32>
    %91 = vector.broadcast %90 : vector<2x1xf32> to vector<2x16xf32>
    %92 = arith.subf %88, %91 : vector<2x16xf32>
    %93 = math.exp %92 : vector<2x16xf32>
    %cst_48 = arith.constant dense<0.000000e+00> : vector<2xf32>
    %94 = vector.multi_reduction <add>, %93, %cst_48 [1] : vector<2x16xf32> to vector<2xf32>
    %95 = vector.shape_cast %94 : vector<2xf32> to vector<2x1xf32>
    %96 = tpu.reciprocal %95 {approx = true} : vector<2x1xf32> -> vector<2x1xf32>
    %97 = vector.broadcast %96 : vector<2x1xf32> to vector<2x16xf32>
    %98 = arith.mulf %93, %97 : vector<2x16xf32>
    %99 = vector.broadcast %82 : vector<1x32xf32> to vector<16x32xf32>
    %100 = arith.mulf %54, %99 : vector<16x32xf32>
    %cst_49 = arith.constant dense<0.000000e+00> : vector<2x32xf32>
    %101 = tpu.matmul %98, %100, %cst_49 {dimension_numbers = #tpu.dot_dimension_numbers<[1], [0], [0], [1], [0, 0, 1, 1], [], []>} : vector<2x16xf32>, vector<16x32xf32>, vector<2x32xf32> -> vector<2x32xf32>
    %102 = arith.addf %75, %101 : vector<2x32xf32>
    %c8_i32_50 = arith.constant 8 : i32
    %103 = vector.broadcast %c8_i32_50 : i32 to vector<1x32xi32>
    %104 = arith.cmpi sge, %74, %103 : vector<1x32xi32>
    %c16_i32 = arith.constant 16 : i32
    %105 = vector.broadcast %c16_i32 : i32 to vector<1x32xi32>
    %106 = arith.cmpi slt, %74, %105 : vector<1x32xi32>
    %107 = arith.andi %104, %106 : vector<1x32xi1>
    %108 = arith.extui %107 : vector<1x32xi1> to vector<1x32xi32>
    %109 = arith.sitofp %108 : vector<1x32xi32> to vector<1x32xf32>
    %110 = vector.broadcast %109 : vector<1x32xf32> to vector<2x32xf32>
    %111 = arith.mulf %62, %110 : vector<2x32xf32>
    %cst_51 = arith.constant dense<0.000000e+00> : vector<2x16xf32>
    %112 = tpu.matmul %111, %47, %cst_51 {dimension_numbers = #tpu.dot_dimension_numbers<[1], [1], [0], [0], [0, 0, 1, 0], [], []>} : vector<2x32xf32>, vector<16x32xf32>, vector<2x16xf32> -> vector<2x16xf32>
    %cst_52 = arith.constant 0.353553385 : f32
    %113 = vector.broadcast %cst_52 : f32 to vector<2x16xf32>
    %114 = arith.mulf %112, %113 : vector<2x16xf32>
    %115 = arith.addf %114, %73 : vector<2x16xf32>
    %cst_53 = arith.constant dense<0xFF800000> : vector<2xf32>
    %116 = vector.multi_reduction <maximumf>, %115, %cst_53 [1] : vector<2x16xf32> to vector<2xf32>
    %117 = vector.shape_cast %116 : vector<2xf32> to vector<2x1xf32>
    %118 = vector.broadcast %117 : vector<2x1xf32> to vector<2x16xf32>
    %119 = arith.subf %115, %118 : vector<2x16xf32>
    %120 = math.exp %119 : vector<2x16xf32>
    %cst_54 = arith.constant dense<0.000000e+00> : vector<2xf32>
    %121 = vector.multi_reduction <add>, %120, %cst_54 [1] : vector<2x16xf32> to vector<2xf32>
    %122 = vector.shape_cast %121 : vector<2xf32> to vector<2x1xf32>
    %123 = tpu.reciprocal %122 {approx = true} : vector<2x1xf32> -> vector<2x1xf32>
    %124 = vector.broadcast %123 : vector<2x1xf32> to vector<2x16xf32>
    %125 = arith.mulf %120, %124 : vector<2x16xf32>
    %126 = vector.broadcast %109 : vector<1x32xf32> to vector<16x32xf32>
    %127 = arith.mulf %54, %126 : vector<16x32xf32>
    %cst_55 = arith.constant dense<0.000000e+00> : vector<2x32xf32>
    %128 = tpu.matmul %125, %127, %cst_55 {dimension_numbers = #tpu.dot_dimension_numbers<[1], [0], [0], [1], [0, 0, 1, 1], [], []>} : vector<2x16xf32>, vector<16x32xf32>, vector<2x32xf32> -> vector<2x32xf32>
    %129 = arith.addf %102, %128 : vector<2x32xf32>
    %c16_i32_56 = arith.constant 16 : i32
    %130 = vector.broadcast %c16_i32_56 : i32 to vector<1x32xi32>
    %131 = arith.cmpi sge, %74, %130 : vector<1x32xi32>
    %c24_i32 = arith.constant 24 : i32
    %132 = vector.broadcast %c24_i32 : i32 to vector<1x32xi32>
    %133 = arith.cmpi slt, %74, %132 : vector<1x32xi32>
    %134 = arith.andi %131, %133 : vector<1x32xi1>
    %135 = arith.extui %134 : vector<1x32xi1> to vector<1x32xi32>
    %136 = arith.sitofp %135 : vector<1x32xi32> to vector<1x32xf32>
    %137 = vector.broadcast %136 : vector<1x32xf32> to vector<2x32xf32>
    %138 = arith.mulf %62, %137 : vector<2x32xf32>
    %cst_57 = arith.constant dense<0.000000e+00> : vector<2x16xf32>
    %139 = tpu.matmul %138, %47, %cst_57 {dimension_numbers = #tpu.dot_dimension_numbers<[1], [1], [0], [0], [0, 0, 1, 0], [], []>} : vector<2x32xf32>, vector<16x32xf32>, vector<2x16xf32> -> vector<2x16xf32>
    %cst_58 = arith.constant 0.353553385 : f32
    %140 = vector.broadcast %cst_58 : f32 to vector<2x16xf32>
    %141 = arith.mulf %139, %140 : vector<2x16xf32>
    %142 = arith.addf %141, %73 : vector<2x16xf32>
    %cst_59 = arith.constant dense<0xFF800000> : vector<2xf32>
    %143 = vector.multi_reduction <maximumf>, %142, %cst_59 [1] : vector<2x16xf32> to vector<2xf32>
    %144 = vector.shape_cast %143 : vector<2xf32> to vector<2x1xf32>
    %145 = vector.broadcast %144 : vector<2x1xf32> to vector<2x16xf32>
    %146 = arith.subf %142, %145 : vector<2x16xf32>
    %147 = math.exp %146 : vector<2x16xf32>
    %cst_60 = arith.constant dense<0.000000e+00> : vector<2xf32>
    %148 = vector.multi_reduction <add>, %147, %cst_60 [1] : vector<2x16xf32> to vector<2xf32>
    %149 = vector.shape_cast %148 : vector<2xf32> to vector<2x1xf32>
    %150 = tpu.reciprocal %149 {approx = true} : vector<2x1xf32> -> vector<2x1xf32>
    %151 = vector.broadcast %150 : vector<2x1xf32> to vector<2x16xf32>
    %152 = arith.mulf %147, %151 : vector<2x16xf32>
    %153 = vector.broadcast %136 : vector<1x32xf32> to vector<16x32xf32>
    %154 = arith.mulf %54, %153 : vector<16x32xf32>
    %cst_61 = arith.constant dense<0.000000e+00> : vector<2x32xf32>
    %155 = tpu.matmul %152, %154, %cst_61 {dimension_numbers = #tpu.dot_dimension_numbers<[1], [0], [0], [1], [0, 0, 1, 1], [], []>} : vector<2x16xf32>, vector<16x32xf32>, vector<2x32xf32> -> vector<2x32xf32>
    %156 = arith.addf %129, %155 : vector<2x32xf32>
    %c24_i32_62 = arith.constant 24 : i32
    %157 = vector.broadcast %c24_i32_62 : i32 to vector<1x32xi32>
    %158 = arith.cmpi sge, %74, %157 : vector<1x32xi32>
    %c32_i32 = arith.constant 32 : i32
    %159 = vector.broadcast %c32_i32 : i32 to vector<1x32xi32>
    %160 = arith.cmpi slt, %74, %159 : vector<1x32xi32>
    %161 = arith.andi %158, %160 : vector<1x32xi1>
    %162 = arith.extui %161 : vector<1x32xi1> to vector<1x32xi32>
    %163 = arith.sitofp %162 : vector<1x32xi32> to vector<1x32xf32>
    %164 = vector.broadcast %163 : vector<1x32xf32> to vector<2x32xf32>
    %165 = arith.mulf %62, %164 : vector<2x32xf32>
    %cst_63 = arith.constant dense<0.000000e+00> : vector<2x16xf32>
    %166 = tpu.matmul %165, %47, %cst_63 {dimension_numbers = #tpu.dot_dimension_numbers<[1], [1], [0], [0], [0, 0, 1, 0], [], []>} : vector<2x32xf32>, vector<16x32xf32>, vector<2x16xf32> -> vector<2x16xf32>
    %cst_64 = arith.constant 0.353553385 : f32
    %167 = vector.broadcast %cst_64 : f32 to vector<2x16xf32>
    %168 = arith.mulf %166, %167 : vector<2x16xf32>
    %169 = arith.addf %168, %73 : vector<2x16xf32>
    %cst_65 = arith.constant dense<0xFF800000> : vector<2xf32>
    %170 = vector.multi_reduction <maximumf>, %169, %cst_65 [1] : vector<2x16xf32> to vector<2xf32>
    %171 = vector.shape_cast %170 : vector<2xf32> to vector<2x1xf32>
    %172 = vector.broadcast %171 : vector<2x1xf32> to vector<2x16xf32>
    %173 = arith.subf %169, %172 : vector<2x16xf32>
    %174 = math.exp %173 : vector<2x16xf32>
    %cst_66 = arith.constant dense<0.000000e+00> : vector<2xf32>
    %175 = vector.multi_reduction <add>, %174, %cst_66 [1] : vector<2x16xf32> to vector<2xf32>
    %176 = vector.shape_cast %175 : vector<2xf32> to vector<2x1xf32>
    %177 = tpu.reciprocal %176 {approx = true} : vector<2x1xf32> -> vector<2x1xf32>
    %178 = vector.broadcast %177 : vector<2x1xf32> to vector<2x16xf32>
    %179 = arith.mulf %174, %178 : vector<2x16xf32>
    %180 = vector.broadcast %163 : vector<1x32xf32> to vector<16x32xf32>
    %181 = arith.mulf %54, %180 : vector<16x32xf32>
    %cst_67 = arith.constant dense<0.000000e+00> : vector<2x32xf32>
    %182 = tpu.matmul %179, %181, %cst_67 {dimension_numbers = #tpu.dot_dimension_numbers<[1], [0], [0], [1], [0, 0, 1, 1], [], []>} : vector<2x16xf32>, vector<16x32xf32>, vector<2x32xf32> -> vector<2x32xf32>
    %183 = arith.addf %156, %182 : vector<2x32xf32>
    %cst_68 = arith.constant dense<0.000000e+00> : vector<2x32xf32>
    %184 = tpu.matmul %14, %7, %cst_68 {dimension_numbers = #tpu.dot_dimension_numbers<[1], [0], [0], [1], [0, 0, 1, 1], [], []>} : vector<2x16xf32>, vector<16x32xf32>, vector<2x32xf32> -> vector<2x32xf32>
    %c0_69 = arith.constant 0 : index
    %c0_70 = arith.constant 0 : index
    %c0_71 = arith.constant 0 : index
    %185 = vector.load %arg12[%c0_69, %c0_70, %c0_71] : memref<1x32x32xf32, #tpu.memory_space<vmem>>, vector<1x32x32xf32>
    %186 = vector.shape_cast %185 : vector<1x32x32xf32> to vector<32x32xf32>
    %cst_72 = arith.constant dense<0.000000e+00> : vector<2x32xf32>
    %187 = tpu.matmul %183, %186, %cst_72 {dimension_numbers = #tpu.dot_dimension_numbers<[1], [0], [0], [1], [0, 0, 1, 1], [], []>} : vector<2x32xf32>, vector<32x32xf32>, vector<2x32xf32> -> vector<2x32xf32>
    %188 = arith.addf %184, %187 : vector<2x32xf32>
    %c0_73 = arith.constant 0 : index
    %c0_74 = arith.constant 0 : index
    %c0_75 = arith.constant 0 : index
    %189 = vector.load %arg13[%c0_73, %c0_74, %c0_75] : memref<1x1x32xf32, #tpu.memory_space<vmem>>, vector<1x1x32xf32>
    %190 = vector.shape_cast %189 : vector<1x1x32xf32> to vector<1x32xf32>
    %191 = vector.broadcast %190 : vector<1x32xf32> to vector<2x32xf32>
    %192 = arith.addf %188, %191 : vector<2x32xf32>
    %c0_76 = arith.constant 0 : index
    %c0_77 = arith.constant 0 : index
    %c0_78 = arith.constant 0 : index
    %193 = vector.load %arg14[%c0_76, %c0_77, %c0_78] : memref<1x1x32xf32, #tpu.memory_space<vmem>>, vector<1x1x32xf32>
    %194 = vector.shape_cast %193 : vector<1x1x32xf32> to vector<1x32xf32>
    %c0_79 = arith.constant 0 : index
    %c0_80 = arith.constant 0 : index
    %c0_81 = arith.constant 0 : index
    %195 = vector.load %arg15[%c0_79, %c0_80, %c0_81] : memref<1x1x32xf32, #tpu.memory_space<vmem>>, vector<1x1x32xf32>
    %196 = vector.shape_cast %195 : vector<1x1x32xf32> to vector<1x32xf32>
    %cst_82 = arith.constant dense<0.000000e+00> : vector<2xf32>
    %197 = vector.multi_reduction <add>, %192, %cst_82 [1] : vector<2x32xf32> to vector<2xf32>
    %198 = vector.shape_cast %197 : vector<2xf32> to vector<2x1xf32>
    %cst_83 = arith.constant 3.200000e+01 : f32
    %199 = vector.broadcast %cst_83 : f32 to vector<2x1xf32>
    %200 = arith.divf %198, %199 : vector<2x1xf32>
    %201 = vector.broadcast %200 : vector<2x1xf32> to vector<2x32xf32>
    %202 = arith.subf %192, %201 : vector<2x32xf32>
    %203 = arith.mulf %202, %202 : vector<2x32xf32>
    %cst_84 = arith.constant dense<0.000000e+00> : vector<2xf32>
    %204 = vector.multi_reduction <add>, %203, %cst_84 [1] : vector<2x32xf32> to vector<2xf32>
    %205 = vector.shape_cast %204 : vector<2xf32> to vector<2x1xf32>
    %cst_85 = arith.constant 3.200000e+01 : f32
    %206 = vector.broadcast %cst_85 : f32 to vector<2x1xf32>
    %207 = arith.divf %205, %206 : vector<2x1xf32>
    %208 = vector.broadcast %200 : vector<2x1xf32> to vector<2x32xf32>
    %209 = arith.subf %192, %208 : vector<2x32xf32>
    %cst_86 = arith.constant 9.99999997E-7 : f32
    %210 = vector.broadcast %cst_86 : f32 to vector<2x1xf32>
    %211 = arith.addf %207, %210 : vector<2x1xf32>
    %212 = math.rsqrt %211 : vector<2x1xf32>
    %213 = vector.broadcast %212 : vector<2x1xf32> to vector<2x32xf32>
    %214 = arith.mulf %209, %213 : vector<2x32xf32>
    %215 = vector.broadcast %194 : vector<1x32xf32> to vector<2x32xf32>
    %216 = arith.mulf %214, %215 : vector<2x32xf32>
    %217 = vector.broadcast %196 : vector<1x32xf32> to vector<2x32xf32>
    %218 = arith.addf %216, %217 : vector<2x32xf32>
    %c0_87 = arith.constant 0 : index
    %c0_88 = arith.constant 0 : index
    %c0_89 = arith.constant 0 : index
    %219 = vector.load %arg16[%c0_87, %c0_88, %c0_89] : memref<1x32x64xf32, #tpu.memory_space<vmem>>, vector<1x32x64xf32>
    %220 = vector.shape_cast %219 : vector<1x32x64xf32> to vector<32x64xf32>
    %cst_90 = arith.constant dense<0.000000e+00> : vector<2x64xf32>
    %221 = tpu.matmul %218, %220, %cst_90 {dimension_numbers = #tpu.dot_dimension_numbers<[1], [0], [0], [1], [0, 0, 1, 1], [], []>} : vector<2x32xf32>, vector<32x64xf32>, vector<2x64xf32> -> vector<2x64xf32>
    %c0_91 = arith.constant 0 : index
    %c0_92 = arith.constant 0 : index
    %c0_93 = arith.constant 0 : index
    %222 = vector.load %arg17[%c0_91, %c0_92, %c0_93] : memref<1x1x64xf32, #tpu.memory_space<vmem>>, vector<1x1x64xf32>
    %223 = vector.shape_cast %222 : vector<1x1x64xf32> to vector<1x64xf32>
    %224 = vector.broadcast %223 : vector<1x64xf32> to vector<2x64xf32>
    %225 = arith.addf %221, %224 : vector<2x64xf32>
    %226 = arith.mulf %225, %225 : vector<2x64xf32>
    %227 = arith.mulf %225, %226 : vector<2x64xf32>
    %cst_94 = arith.constant 4.471500e-02 : f32
    %228 = vector.broadcast %cst_94 : f32 to vector<2x64xf32>
    %229 = arith.mulf %228, %227 : vector<2x64xf32>
    %230 = arith.addf %225, %229 : vector<2x64xf32>
    %cst_95 = arith.constant 0.797884583 : f32
    %231 = vector.broadcast %cst_95 : f32 to vector<2x64xf32>
    %232 = arith.mulf %231, %230 : vector<2x64xf32>
    %233 = math.tanh %232 : vector<2x64xf32>
    %cst_96 = arith.constant 1.000000e+00 : f32
    %234 = vector.broadcast %cst_96 : f32 to vector<2x64xf32>
    %235 = arith.addf %234, %233 : vector<2x64xf32>
    %cst_97 = arith.constant 5.000000e-01 : f32
    %236 = vector.broadcast %cst_97 : f32 to vector<2x64xf32>
    %237 = arith.mulf %236, %235 : vector<2x64xf32>
    %238 = arith.mulf %225, %237 : vector<2x64xf32>
    %c0_98 = arith.constant 0 : index
    %c0_99 = arith.constant 0 : index
    %c0_100 = arith.constant 0 : index
    %239 = vector.load %arg18[%c0_98, %c0_99, %c0_100] : memref<1x64x32xf32, #tpu.memory_space<vmem>>, vector<1x64x32xf32>
    %240 = vector.shape_cast %239 : vector<1x64x32xf32> to vector<64x32xf32>
    %cst_101 = arith.constant dense<0.000000e+00> : vector<2x32xf32>
    %241 = tpu.matmul %238, %240, %cst_101 {dimension_numbers = #tpu.dot_dimension_numbers<[1], [0], [0], [1], [0, 0, 1, 1], [], []>} : vector<2x64xf32>, vector<64x32xf32>, vector<2x32xf32> -> vector<2x32xf32>
    %242 = arith.addf %192, %241 : vector<2x32xf32>
    %c0_102 = arith.constant 0 : index
    %c0_103 = arith.constant 0 : index
    %c0_104 = arith.constant 0 : index
    %243 = vector.load %arg19[%c0_102, %c0_103, %c0_104] : memref<1x1x32xf32, #tpu.memory_space<vmem>>, vector<1x1x32xf32>
    %244 = vector.shape_cast %243 : vector<1x1x32xf32> to vector<1x32xf32>
    %245 = vector.broadcast %244 : vector<1x32xf32> to vector<2x32xf32>
    %246 = arith.addf %242, %245 : vector<2x32xf32>
    %c0_105 = arith.constant 0 : index
    %c0_106 = arith.constant 0 : index
    %c0_107 = arith.constant 0 : index
    %247 = vector.load %arg20[%c0_105, %c0_106, %c0_107] : memref<1x1x32xf32, #tpu.memory_space<vmem>>, vector<1x1x32xf32>
    %248 = vector.shape_cast %247 : vector<1x1x32xf32> to vector<1x32xf32>
    %c0_108 = arith.constant 0 : index
    %c0_109 = arith.constant 0 : index
    %c0_110 = arith.constant 0 : index
    %249 = vector.load %arg21[%c0_108, %c0_109, %c0_110] : memref<1x1x32xf32, #tpu.memory_space<vmem>>, vector<1x1x32xf32>
    %250 = vector.shape_cast %249 : vector<1x1x32xf32> to vector<1x32xf32>
    %cst_111 = arith.constant dense<0.000000e+00> : vector<2xf32>
    %251 = vector.multi_reduction <add>, %246, %cst_111 [1] : vector<2x32xf32> to vector<2xf32>
    %252 = vector.shape_cast %251 : vector<2xf32> to vector<2x1xf32>
    %cst_112 = arith.constant 3.200000e+01 : f32
    %253 = vector.broadcast %cst_112 : f32 to vector<2x1xf32>
    %254 = arith.divf %252, %253 : vector<2x1xf32>
    %255 = vector.broadcast %254 : vector<2x1xf32> to vector<2x32xf32>
    %256 = arith.subf %246, %255 : vector<2x32xf32>
    %257 = arith.mulf %256, %256 : vector<2x32xf32>
    %cst_113 = arith.constant dense<0.000000e+00> : vector<2xf32>
    %258 = vector.multi_reduction <add>, %257, %cst_113 [1] : vector<2x32xf32> to vector<2xf32>
    %259 = vector.shape_cast %258 : vector<2xf32> to vector<2x1xf32>
    %cst_114 = arith.constant 3.200000e+01 : f32
    %260 = vector.broadcast %cst_114 : f32 to vector<2x1xf32>
    %261 = arith.divf %259, %260 : vector<2x1xf32>
    %262 = vector.broadcast %254 : vector<2x1xf32> to vector<2x32xf32>
    %263 = arith.subf %246, %262 : vector<2x32xf32>
    %cst_115 = arith.constant 9.99999997E-7 : f32
    %264 = vector.broadcast %cst_115 : f32 to vector<2x1xf32>
    %265 = arith.addf %261, %264 : vector<2x1xf32>
    %266 = math.rsqrt %265 : vector<2x1xf32>
    %267 = vector.broadcast %266 : vector<2x1xf32> to vector<2x32xf32>
    %268 = arith.mulf %263, %267 : vector<2x32xf32>
    %269 = vector.broadcast %248 : vector<1x32xf32> to vector<2x32xf32>
    %270 = arith.mulf %268, %269 : vector<2x32xf32>
    %271 = vector.broadcast %250 : vector<1x32xf32> to vector<2x32xf32>
    %272 = arith.addf %270, %271 : vector<2x32xf32>
    %c0_116 = arith.constant 0 : index
    %c0_117 = arith.constant 0 : index
    %c0_118 = arith.constant 0 : index
    %273 = vector.load %arg22[%c0_116, %c0_117, %c0_118] : memref<1x2x32xf32, #tpu.memory_space<vmem>>, vector<1x2x32xf32>
    %274 = vector.shape_cast %273 : vector<1x2x32xf32> to vector<2x32xf32>
    %275 = vector.shape_cast %272 : vector<2x32xf32> to vector<1x2x32xf32>
    tpu.vector_store %arg22[%c0_116, %c0_117, %c0_118], %275 {strides = array<i32>} : memref<1x2x32xf32, #tpu.memory_space<vmem>>, vector<1x2x32xf32>,
    return
  }
  func.func @transform_0(%arg0: i32) -> (i32, i32, i32) {
    %c0_i32 = arith.constant 0 : i32
    %c0_i32_0 = arith.constant 0 : i32
    %c0_i32_1 = arith.constant 0 : i32
    return %arg0, %c0_i32, %c0_i32_0 : i32, i32, i32
  }
  func.func @transform_1(%arg0: i32) -> (i32, i32, i32) {
    %c0_i32 = arith.constant 0 : i32
    %c0_i32_0 = arith.constant 0 : i32
    %c0_i32_1 = arith.constant 0 : i32
    return %arg0, %c0_i32, %c0_i32_0 : i32, i32, i32
  }
  func.func @transform_2(%arg0: i32) -> (i32, i32, i32) {
    %c0_i32 = arith.constant 0 : i32
    %c0_i32_0 = arith.constant 0 : i32
    %c0_i32_1 = arith.constant 0 : i32
    return %arg0, %c0_i32, %c0_i32_0 : i32, i32, i32
  }
  func.func @transform_3(%arg0: i32) -> (i32, i32, i32) {
    %c0_i32 = arith.constant 0 : i32
    %c0_i32_0 = arith.constant 0 : i32
    %c0_i32_1 = arith.constant 0 : i32
    return %arg0, %c0_i32, %c0_i32_0 : i32, i32, i32
  }
  func.func @transform_4(%arg0: i32) -> (i32, i32, i32) {
    %c0_i32 = arith.constant 0 : i32
    %c0_i32_0 = arith.constant 0 : i32
    %c0_i32_1 = arith.constant 0 : i32
    return %arg0, %c0_i32, %c0_i32_0 : i32, i32, i32
  }
  func.func @transform_5(%arg0: i32) -> (i32, i32, i32) {
    %c0_i32 = arith.constant 0 : i32
    %c0_i32_0 = arith.constant 0 : i32
    %c0_i32_1 = arith.constant 0 : i32
    return %arg0, %c0_i32, %c0_i32_0 : i32, i32, i32
  }
  func.func @transform_6(%arg0: i32) -> (i32, i32, i32) {
    %c0_i32 = arith.constant 0 : i32
    %c0_i32_0 = arith.constant 0 : i32
    %c0_i32_1 = arith.constant 0 : i32
    return %arg0, %c0_i32, %c0_i32_0 : i32, i32, i32
  }
  func.func @transform_7(%arg0: i32) -> (i32, i32, i32) {
    %c0_i32 = arith.constant 0 : i32
    %c0_i32_0 = arith.constant 0 : i32
    %c0_i32_1 = arith.constant 0 : i32
    return %arg0, %c0_i32, %c0_i32_0 : i32, i32, i32
  }
  func.func @transform_8(%arg0: i32) -> (i32, i32, i32) {
    %c0_i32 = arith.constant 0 : i32
    %c0_i32_0 = arith.constant 0 : i32
    %c0_i32_1 = arith.constant 0 : i32
    return %arg0, %c0_i32, %c0_i32_0 : i32, i32, i32
  }
  func.func @transform_9(%arg0: i32) -> (i32, i32, i32) {
    %c0_i32 = arith.constant 0 : i32
    %c0_i32_0 = arith.constant 0 : i32
    %c0_i32_1 = arith.constant 0 : i32
    return %arg0, %c0_i32, %c0_i32_0 : i32, i32, i32
  }
  func.func @transform_10(%arg0: i32) -> (i32, i32, i32) {
    %c0_i32 = arith.constant 0 : i32
    %c0_i32_0 = arith.constant 0 : i32
    %c0_i32_1 = arith.constant 0 : i32
    return %arg0, %c0_i32, %c0_i32_0 : i32, i32, i32
  }
  func.func @transform_11(%arg0: i32) -> (i32, i32, i32) {
    %c0_i32 = arith.constant 0 : i32
    %c0_i32_0 = arith.constant 0 : i32
    %c0_i32_1 = arith.constant 0 : i32
    return %arg0, %c0_i32, %c0_i32_0 : i32, i32, i32
  }
  func.func @transform_12(%arg0: i32) -> (i32, i32, i32) {
    %c0_i32 = arith.constant 0 : i32
    %c0_i32_0 = arith.constant 0 : i32
    %c0_i32_1 = arith.constant 0 : i32
    return %arg0, %c0_i32, %c0_i32_0 : i32, i32, i32
  }
  func.func @transform_13(%arg0: i32) -> (i32, i32, i32) {
    %c0_i32 = arith.constant 0 : i32
    %c0_i32_0 = arith.constant 0 : i32
    %c0_i32_1 = arith.constant 0 : i32
    return %arg0, %c0_i32, %c0_i32_0 : i32, i32, i32
  }
  func.func @transform_14(%arg0: i32) -> (i32, i32, i32) {
    %c0_i32 = arith.constant 0 : i32
    %c0_i32_0 = arith.constant 0 : i32
    %c0_i32_1 = arith.constant 0 : i32
    return %arg0, %c0_i32, %c0_i32_0 : i32, i32, i32
  }
  func.func @transform_15(%arg0: i32) -> (i32, i32, i32) {
    %c0_i32 = arith.constant 0 : i32
    %c0_i32_0 = arith.constant 0 : i32
    %c0_i32_1 = arith.constant 0 : i32
    return %arg0, %c0_i32, %c0_i32_0 : i32, i32, i32
  }
  func.func @transform_16(%arg0: i32) -> (i32, i32, i32) {
    %c0_i32 = arith.constant 0 : i32
    %c0_i32_0 = arith.constant 0 : i32
    %c0_i32_1 = arith.constant 0 : i32
    return %arg0, %c0_i32, %c0_i32_0 : i32, i32, i32
  }
  func.func @transform_17(%arg0: i32) -> (i32, i32, i32) {
    %c0_i32 = arith.constant 0 : i32
    %c0_i32_0 = arith.constant 0 : i32
    %c0_i32_1 = arith.constant 0 : i32
    return %arg0, %c0_i32, %c0_i32_0 : i32, i32, i32
  }
  func.func @transform_18(%arg0: i32) -> (i32, i32, i32) {
    %c0_i32 = arith.constant 0 : i32
    %c0_i32_0 = arith.constant 0 : i32
    %c0_i32_1 = arith.constant 0 : i32
    return %arg0, %c0_i32, %c0_i32_0 : i32, i32, i32
  }
  func.func @transform_19(%arg0: i32) -> (i32, i32, i32) {
    %c0_i32 = arith.constant 0 : i32
    %c0_i32_0 = arith.constant 0 : i32
    %c0_i32_1 = arith.constant 0 : i32
    return %arg0, %c0_i32, %c0_i32_0 : i32, i32, i32
  }
  func.func @transform_20(%arg0: i32) -> (i32, i32, i32) {
    %c0_i32 = arith.constant 0 : i32
    %c0_i32_0 = arith.constant 0 : i32
    %c0_i32_1 = arith.constant 0 : i32
    return %arg0, %c0_i32, %c0_i32_0 : i32, i32, i32
  }
  func.func @transform_21(%arg0: i32) -> (i32, i32, i32) {
    %c0_i32 = arith.constant 0 : i32
    %c0_i32_0 = arith.constant 0 : i32
    %c0_i32_1 = arith.constant 0 : i32
    return %arg0, %c0_i32, %c0_i32_0 : i32, i32, i32
  }
}

</mosaic_0001>

<bundles_post_ra>
// kernel: timm_encoder_forward.1
= control target key start
LH: loop header
LB: loop body
LE: loop exit
PB: predicated region body
PF: predicated region fallthrough
CT: control target
= control target key end

     0   :  { %s3720_s0 = inlined_call_operand.vmem [shape: f32[3,16,192], index: 0, kind: input, shape index: {}]   ;;  %s3721_s1 = inlined_call_operand.vmem [shape: f32[3,16,32], index: 1, kind: input, shape index: {}]   ;;  %s3722_s2 = inlined_call_operand.vmem [shape: f32[3,192,32], index: 2, kind: input, shape index: {}]   ;;  %s3723_s3 = inlined_call_operand.vmem [shape: f32[3,1,32], index: 3, kind: input, shape index: {}]   ;;  %s3724_s4 = inlined_call_operand.vmem [shape: f32[3,1,32], index: 4, kind: input, shape index: {}]   ;;  %s3725_s5 = inlined_call_operand.vmem [shape: f32[3,32,32], index: 5, kind: input, shape index: {}]   ;;  %s3726_s6 = inlined_call_operand.vmem [shape: f32[3,32,32], index: 6, kind: input, shape index: {}]   ;;  %s3727_s7 = inlined_call_operand.vmem [shape: f32[3,32,32], index: 7, kind: input, shape index: {}]   ;;  %s3728_s8 = inlined_call_operand.vmem [shape: f32[3,1,32], index: 8, kind: input, shape index: {}]   ;;  %s3729_s9 = inlined_call_operand.vmem [shape: f32[3,1,32], index: 9, kind: input, shape index: {}]   ;;  %s3730_s10 = inlined_call_operand.vmem [shape: f32[3,1,32], index: 10, kind: input, shape index: {}]   ;;  %s3731_s11 = inlined_call_operand.vmem [shape: f32[3,32,32], index: 11, kind: input, shape index: {}]   ;;  %s3732_s12 = inlined_call_operand.vmem [shape: f32[3,1,32], index: 12, kind: input, shape index: {}]   ;;  %s3733_s13 = inlined_call_operand.vmem [shape: f32[3,1,32], index: 13, kind: input, shape index: {}]   ;;  %s3734_s14 = inlined_call_operand.vmem [shape: f32[3,1,32], index: 14, kind: input, shape index: {}]   ;;  %s3735_s15 = inlined_call_operand.vmem [shape: f32[3,32,64], index: 15, kind: input, shape index: {}]   ;;  %s3736_s16 = inlined_call_operand.vmem [shape: f32[3,1,64], index: 16, kind: input, shape index: {}]   ;;  %s3737_s17 = inlined_call_operand.vmem [shape: f32[3,64,32], index: 17, kind: input, shape index: {}]   ;;  %s3738_s18 = inlined_call_operand.vmem [shape: f32[3,1,32], index: 18, kind: input, shape index: {}]   ;;  %s3739_s19 = inlined_call_operand.vmem [shape: f32[3,1,32], index: 19, kind: input, shape index: {}]   ;;  %s3740_s20 = inlined_call_operand.vmem [shape: f32[3,1,32], index: 20, kind: input, shape index: {}]   ;;  %s3741_s21 = inlined_call_operand.vmem [shape: f32[3,2,32], index: 21, kind: output, shape index: {}]  }
   0x1   :  { %3742 = sst [smem:[#allocation2_spill]] %s3720_s0 }
   0x2   :  { %3743 = sst [smem:[#allocation3_spill]] %s3721_s1 }
   0x3   :  { %3744 = sst [smem:[#allocation4_spill]] %s3722_s2  ;;  %s3392_s2 = smov 0  }
   0x4   :  { %3745 = sst [smem:[#allocation5_spill]] %s3723_s3 }
   0x5   :  { %3746 = sst [smem:[#allocation6_spill]] %s3724_s4 }
   0x6   :  { %3747 = sst [smem:[#allocation7_spill]] %s3725_s5 }
   0x7 LB: > { %s2823_s25 = sadd.s32 4294967295, %s3276_s2   ;;  %p2827_p0 = scmp.ge.s32.totalorder %s3276_s2, 1  ;;  %s3276_s2 = sphi %s3392_s2, %s31_s2  }
   0x8   : > { %p763_p1 = scmp.lt.s32.totalorder %s3276_s2, 4 }
   0xa   : > { %p764_p2 = pnand %p2827_p0, %p763_p1 }
   0xb   : > { %p898_p3 = scmp.lt.s32.totalorder (!%p764_p2), %s2823_s25, 2  ;;  %v3278_v0 = vmov (!%p764_p2), 0.0|0.0   ;;  %vm1013_vm0 = vcmask (!%p764_p2), 523264   ;;  %s3748_s29 = sld [smem:[#allocation2_spill]] (!%p764_p2)  ;;  %vm1105_vm1 = vcmask (!%p764_p2), 261120   ;;  %vm3279_vm2 = vmmov (!%p764_p2), 0  }
   0xc   : > { %767 = sbr.rel (%p764_p2) target bundleno = 3626 (0xe2a), region = 104  ;;  %3111 = vmatprep.subr.bf16.mxu0 (!%p764_p2), %v3278_v0  ;;  %s3749_s5 = sld [smem:[#allocation4_spill]] (!%p764_p2)  ;;  %vm1327_vm4 = vcmask (!%p764_p2), 130048   ;;  %vm3531_vm9 = vmpackc.low (!%p764_p2), %vm1105_vm1, %vm1105_vm1 }
   0xd   : > { %s3751_s1 = sld [smem:[#allocation5_spill]] (!%p764_p2)  ;;  %s3752_s28 = sld [smem:[#allocation6_spill]] (!%p764_p2) }
   0xe   : > { %s3753_s30 = sld [smem:[#allocation7_spill]] (!%p764_p2) }
  0x13   : > { %s3757_s25 = smov (!%p898_p3, %s2823_s25), 2 }
  0x14   : > { %s3231_s26 = smul.u32 192, %s3757_s25  ;;  %s3405_s27 = sshll.u32 %s3757_s25, 5 }
  0x15   : > { %s3411_s0 = scalar_lea.vmem %s3748_s29, %s3405_s27  ;;  %s2894_s23 = sshll.u32 %s3757_s25, 4 }
  0x16   : > { %s3416_s22 = scalar_lea.vmem %s3749_s5, %s3231_s26  ;;  %v984_v1 = vld [vmem:[%s3411_s0 + $0x8] sm:$0xff]  ;;  %v983_v38 = vld [vmem:[%s3411_s0] sm:$0xff]  ;;  %v986_v39 = vld [vmem:[%s3411_s0 + $0x18] sm:$0xff]  ;;  %s3750_s26 = sld [smem:[#allocation3_spill]] }
  0x17   : > { %v987_v2 = vld [vmem:[%s3416_s22] sm:$0xff]  ;;  %v988_v3 = vld [vmem:[%s3416_s22 + $0x8] sm:$0xff]  ;;  %v989_v4 = vld [vmem:[%s3416_s22 + $0x10] sm:$0xff]  ;;  %2846 = vmatprep.mubr.msk.f32.mxu0 %vm1013_vm0, %v984_v1  ;;  %s933_s5 = scalar_lea.vmem %s3727_s7, %s3405_s27  ;;  %s915_s24 = scalar_lea.vmem %s3751_s1, %s3757_s25 }
  0x18   : > { %v3112_v5 = vpack.c.bf16 %v988_v3, %v987_v2  ;;  %v990_v6 = vld [vmem:[%s3416_s22 + $0x18] sm:$0xff]  ;;  %v991_v8 = vld [vmem:[%s3416_s22 + $0x20] sm:$0xff]  ;;  %v992_v9 = vld [vmem:[%s3416_s22 + $0x28] sm:$0xff]  ;;  %s918_s29 = scalar_lea.vmem %s3752_s28, %s3757_s25  ;;  %s939_s1 = scalar_lea.vmem %s3729_s9, %s3757_s25 }
  0x19   : > { %v3115_v7 = vpack.c.bf16 %v990_v6, %v989_v4  ;;  %v3118_v10 = vpack.c.bf16 %v992_v9, %v991_v8  ;;  %v993_v11 = vld [vmem:[%s3416_s22 + $0x30] sm:$0xff]  ;;  %v994_v12 = vld [vmem:[%s3416_s22 + $0x38] sm:$0xff]  ;;  %v995_v14 = vld [vmem:[%s3416_s22 + $0x40] sm:$0xff] }
  0x1a   : > { %3113 = vmatpush1.bf16.msra.mxu0 %v3112_v5  ;;  %v3121_v13 = vpack.c.bf16 %v994_v12, %v993_v11  ;;  %v996_v15 = vld [vmem:[%s3416_s22 + $0x48] sm:$0xff]  ;;  %v997_v17 = vld [vmem:[%s3416_s22 + $0x50] sm:$0xff]  ;;  %v998_v18 = vld [vmem:[%s3416_s22 + $0x58] sm:$0xff] }
  0x1b   : > { %3114 = vmatprep.subr.bf16.mxu0 %v3278_v0  ;;  %v3124_v16 = vpack.c.bf16 %v996_v15, %v995_v14  ;;  %v3127_v19 = vpack.c.bf16 %v998_v18, %v997_v17  ;;  %v999_v20 = vld [vmem:[%s3416_s22 + $0x60] sm:$0xff]  ;;  %v1000_v21 = vld [vmem:[%s3416_s22 + $0x68] sm:$0xff]  ;;  %v1001_v23 = vld [vmem:[%s3416_s22 + $0x70] sm:$0xff] }
  0x1c   : > { %v3130_v22 = vpack.c.bf16 %v1000_v21, %v999_v20  ;;  %v1002_v24 = vld [vmem:[%s3416_s22 + $0x78] sm:$0xff]  ;;  %v1003_v26 = vld [vmem:[%s3416_s22 + $0x80] sm:$0xff]  ;;  %v1004_v27 = vld [vmem:[%s3416_s22 + $0x88] sm:$0xff]  ;;  %s907_s3 = scalar_lea.vmem %s3750_s26, %s2894_s23  ;;  %s978_s23 = scalar_lea.vmem %s3740_s20, %s3757_s25 }
  0x1d   : > { %v3133_v25 = vpack.c.bf16 %v1002_v24, %v1001_v23  ;;  %v3136_v28 = vpack.c.bf16 %v1004_v27, %v1003_v26  ;;  %v1005_v29 = vld [vmem:[%s3416_s22 + $0x90] sm:$0xff]  ;;  %v1006_v30 = vld [vmem:[%s3416_s22 + $0x98] sm:$0xff]  ;;  %v1007_v32 = vld [vmem:[%s3416_s22 + $0xa0] sm:$0xff] }
  0x1e   : > { %3116 = vmatpush1.bf16.msra.mxu0 %v3115_v7  ;;  %v3139_v31 = vpack.c.bf16 %v1006_v30, %v1005_v29  ;;  %v1008_v33 = vld [vmem:[%s3416_s22 + $0xa8] sm:$0xff]  ;;  %v1009_v35 = vld [vmem:[%s3416_s22 + $0xb0] sm:$0xff]  ;;  %v1010_v36 = vld [vmem:[%s3416_s22 + $0xb8] sm:$0xff]  ;;  %v3280_v7 = vmov 0.0  }
  0x1f   : > { %3117 = vmatprep.subr.bf16.mxu0 %v3278_v0  ;;  %v3142_v34 = vpack.c.bf16 %v1008_v33, %v1007_v32  ;;  %v3145_v37 = vpack.c.bf16 %v1010_v36, %v1009_v35  ;;  %v985_v40 = vld [vmem:[%s3411_s0 + $0x10] sm:$0xff]  ;;  %v1011_v41 = vld [vmem:[%s907_s3] sm:$0xff]  ;;  %v1012_v45 = vld [vmem:[%s907_s3 + $0x8] sm:$0xff]  ;;  %s928_s0 = scalar_lea.vmem %s3726_s6, %s3405_s27  ;;  %s942_s3 = scalar_lea.vmem %s3730_s10, %s3757_s25 }
  0x20   : > { %v1149_v61 = vld [vmem:[%s928_s0] sm:$0xff]  ;;  %v1150_v62 = vld [vmem:[%s928_s0 + $0x8] sm:$0xff]  ;;  %v1151_v63 = vld [vmem:[%s928_s0 + $0x10] sm:$0xff] }
  0x21   : > { %v3147_v1 = vpack.c.bf16 %v1150_v62, %v1149_v61  ;;  %v1152_v2 = vld [vmem:[%s928_s0 + $0x18] sm:$0xff]  ;;  %v1241_v4 = vld [vmem:[%s933_s5] sm:$0xff]  ;;  %v1242_v5 = vld [vmem:[%s933_s5 + $0x8] sm:$0xff]  ;;  %s936_s0 = scalar_lea.vmem %s3728_s8, %s3757_s25 }
  0x22   : > { %3119 = vmatpush1.bf16.msra.mxu0 %v3118_v10  ;;  %v3151_v3 = vpack.c.bf16 %v1152_v2, %v1151_v63  ;;  %v3155_v6 = vpack.c.bf16 %v1242_v5, %v1241_v4  ;;  %v2849_v15 = vld [vmem:[%s915_s24] ss:$0 sm:$0xff]  ;;  %v1243_v23 = vld [vmem:[%s933_s5 + $0x10] sm:$0xff]  ;;  %v1244_v24 = vld [vmem:[%s933_s5 + $0x18] sm:$0xff]  ;;  %s923_s5 = scalar_lea.vmem %s3753_s30, %s3405_s27  ;;  %s956_s30 = scalar_lea.vmem %s3734_s14, %s3757_s25 }
  0x23   : > { %3120 = vmatprep.subr.bf16.mxu0 %v3278_v0  ;;  %3148 = vmatprep.subr.bf16.mxu1 %v3147_v1  ;;  %v2850_v17 = vld [vmem:[%s918_s29] ss:$0 sm:$0xff]  ;;  %v3159_v27 = vpack.c.bf16 %v1244_v24, %v1243_v23  ;;  %v1402_v32 = vld [vmem:[%s923_s5 + $0x8] sm:$0xff]  ;;  %v1403_v36 = vld [vmem:[%s923_s5 + $0x10] sm:$0xff] }
  0x24   : > { %3150 = vmatpush3.bf16.msra.mxu1 %v3147_v1 }
  0x25   : > { %3152 = vmatprep.subr.bf16.mxu1 %v3151_v3 }
  0x26   : > { %3122 = vmatpush1.bf16.msra.mxu0 %v3121_v13 }
  0x27   : > { %3123 = vmatprep.subr.bf16.mxu0 %v3278_v0 }
  0x28   : > { %3154 = vmatpush3.bf16.msra.mxu1 %v3151_v3 }
  0x29   : > { %3156 = vmatprep.subr.bf16.mxu1 %v3155_v6 }
  0x2a   : > { %3125 = vmatpush1.bf16.msra.mxu0 %v3124_v16 }
  0x2b   : > { %3126 = vmatprep.subr.bf16.mxu0 %v3278_v0 }
  0x2e   : > { %3128 = vmatpush1.bf16.msra.mxu0 %v3127_v19 }
  0x2f   : > { %3129 = vmatprep.subr.bf16.mxu0 %v3278_v0 }
  0x32   : > { %3131 = vmatpush1.bf16.msra.mxu0 %v3130_v22  ;;  %v1095_v22 = vlaneseq }
  0x33   : > { %3132 = vmatprep.subr.bf16.mxu0 %v3278_v0 }
  0x34   : > { %v3499_v29 = vand.u32 127, %v1095_v22 }
  0x36   : > { %3134 = vmatpush1.bf16.msra.mxu0 %v3133_v25  ;;  %vm1592_vm5 = vcmp.ge.s32.totalorder %v3499_v29, 8  ;;  %vm1593_vm6 = vcmp.lt.s32.totalorder %v3499_v29, 16  ;;  %vm1832_vm7 = vcmp.ge.s32.totalorder %v3499_v29, 16  ;;  %vm1833_vm8 = vcmp.lt.s32.totalorder %v3499_v29, 24 }
  0x37   : > { %3135 = vmatprep.subr.bf16.mxu0 %v3278_v0  ;;  %vm2000_vm10 = vcmp.ge.s32.totalorder %v3499_v29, 24  ;;  %vm2001_vm11 = vcmp.lt.s32.totalorder %v3499_v29, 32  ;;  %vm1594_vm12 = vmand %vm1592_vm5, %vm1593_vm6  ;;  %vm1492_vm14 = vcmp.lt.s32.totalorder %v3499_v29, 8 }
  0x38   : > { %vm1834_vm13 = vmand %vm1832_vm7, %vm1833_vm8  ;;  %vm1578_vm7 = vcmask 123904  }
  0x39   : > { %vm2002_vm15 = vmand %vm2000_vm10, %vm2001_vm11 }
  0x3a   : > { %3137 = vmatpush1.bf16.msra.mxu0 %v3136_v28  ;;  %v3495_v28 = vshrl.u32 %v1095_v22, 7 }
  0x3b   : > { %3138 = vmatprep.subr.bf16.mxu0 %v3278_v0 }
  0x3c   : > { %v1099_v30 = vmul.u32 8, %v3495_v28 }
  0x3e   : > { %3140 = vmatpush1.bf16.msra.mxu0 %v3139_v31  ;;  %vm1100_vm3 = vcmp.eq.s32.totalorder %v3499_v29, %v1099_v30  ;;  %v1401_v31 = vld [vmem:[%s923_s5] sm:$0xff] }
  0x3f   : > { %3141 = vmatprep.subr.bf16.mxu0 %v3278_v0  ;;  %v3167_v35 = vpack.c.bf16 %v1402_v32, %v1401_v31 }
  0x42   : > { %3143 = vmatpush1.bf16.msra.mxu0 %v3142_v34  ;;  %v3512_v34 = vsel %vm1100_vm3, 1.0, %v3280_v7 }
  0x43   : > { %3144 = vmatprep.subr.bf16.mxu0 %v3278_v0 }
  0x46   : > { %3146 = vmatpush1.bf16.msra.mxu0 %v3145_v37  ;;  %v1404_v37 = vld [vmem:[%s923_s5 + $0x18] sm:$0xff]  ;;  %s947_s5 = scalar_lea.vmem %s3731_s11, %s3405_s27 }
  0x47   : > { %3186 = vmatprep.subr.bf16.mxu0 %v3278_v0 }
  0x49   : > { %1085 = vmatmul.mubr.f32.vlgmr.msra.gmra.mrb[0].mxu0 %v983_v38  ;;  %v3170_v38 = vpack.c.bf16 %v1404_v37, %v1403_v36 }
  0x4a   : > { %2847 = vmatprep.mubr.msk.f32.mxu0 %vm1013_vm0, %v986_v39  ;;  %v2851_v39 = vld [vmem:[%s939_s1] ss:$0 sm:$0xff]  ;;  %s950_s1 = scalar_lea.vmem %s3732_s12, %s3757_s25 }
  0x4d   : > { %1090 = vmatmul.mubr.f32.gmra.mrb[2].mxu0 %v985_v40 }
  0x4e   : > { %3039 = vmatprep.mubr.msk.f32.mxu0 %vm3279_vm2, %v3280_v7 }
 0x11c   : > { %v1086_v42 = vpop.f32.mrb[0].mxu0 }
 0x11d   : > { %v3464_v43 = vadd.f32 %v1086_v42, %v1011_v41  ;;  %v1088_v44 = vpop.f32.mrb[1].mxu0 }
 0x11f   : > { %v1106_v46 = vsel %vm1105_vm1, %v3464_v43, 0.0 }
 0x120   : > { %v1091_v47 = vpop.f32.mrb[2].mxu0  ;;  %1107 = vadd.xlane.f32.xlu0 %v1106_v46 }
 0x121   : > { %v3468_v48 = vadd.f32 %v1091_v47, %v1012_v45  ;;  %v1093_v49 = vpop.f32.mrb[3].mxu0  ;;  %v2854_v47 = vld [vmem:[%s942_s3] ss:$0 sm:$0xff]  ;;  %s961_s3 = scalar_lea.vmem %s3735_s15, %s3405_s27 }
 0x123   : > { %v1109_v50 = vsel %vm1105_vm1, %v3468_v48, 0.0 }
 0x124   : > { %1110 = vadd.xlane.f32.xlu0 %v1109_v50  ;;  %v2860_v50 = vsel %vm1492_vm14, 1.0, %v3280_v7 }
 0x1ad   : > { %v1108_v51 = vpop.xlane.xlu0 %1107 }
 0x1ae   : > { %v1113_v52 = vmul.f32 0.03125, %v1108_v51  ;;  %v2864_v51 = vsel %vm1594_vm12, 1.0, %v3280_v7 }
 0x1b0   : > { %v1115_v53 = vsub.f32 %v3464_v43, %v1113_v52  ;;  %v2870_v52 = vsel %vm1834_vm13, 1.0, %v3280_v7 }
 0x1b1   : > { %v1111_v54 = vpop.xlane.xlu0 %1110 }
 0x1b2   : > { %v1114_v55 = vmul.f32 0.03125, %v1111_v54  ;;  %v1117_v56 = vmul.f32 %v1115_v53, %v1115_v53 }
 0x1b4   : > { %v1116_v57 = vsub.f32 %v3468_v48, %v1114_v55  ;;  %v1119_v58 = vsel %vm1105_vm1, %v1117_v56, 0.0 }
 0x1b5   : > { %1120 = vadd.xlane.f32.xlu1 %v1119_v58 }
 0x1b6   : > { %v1118_v59 = vmul.f32 %v1116_v57, %v1116_v57 }
 0x1b8   : > { %v1122_v60 = vsel %vm1105_vm1, %v1118_v59, 0.0 }
 0x1b9   : > { %1123 = vadd.xlane.f32.xlu1 %v1122_v60 }
 0x242   : > { %v1121_v8 = vpop.xlane.xlu1 %1120 }
 0x243   : > { %v1125_v9 = vmul.f32 0.03125, %v1121_v8 }
 0x245   : > { %v1127_v10 = vadd.f32 1e-06, %v1125_v9  ;;  %v2858_v9 = vld [vmem:[%s936_s0] ss:$0 sm:$0xff]  ;;  %s953_s0 = scalar_lea.vmem %s3733_s13, %s3757_s25 }
 0x246   : > { %v1124_v11 = vpop.xlane.xlu1 %1123 }
 0x247   : > { %3244 = vrsqrt.f32 %v1127_v10  ;;  %v1126_v12 = vmul.f32 0.03125, %v1124_v11 }
 0x249   : > { %v1128_v13 = vadd.f32 1e-06, %v1126_v12 }
 0x24b   : > { %3246 = vrsqrt.f32 %v1128_v13 }
 0x251   : > { %v3245_v14 = vpop.eup %3244 }
 0x252   : > { %v1131_v16 = vmul.f32 %v3245_v14, %v1115_v53  ;;  %v3552_v53 = vsel %vm2002_vm15, 1.0, %v3280_v7 }
 0x254   : > { %v1139_v18 = vmul.f32 %v2849_v15, %v1131_v16  ;;  %v1485_v16 = vshra.s32 %v3499_v29, 3 }
 0x255   : > { %v3247_v19 = vpop.eup %3246 }
 0x256   : > { %v1132_v20 = vmul.f32 %v3247_v19, %v1116_v57  ;;  %v1147_v21 = vadd.f32 %v2850_v17, %v1139_v18  ;;  %vm1486_vm3 = vcmp.eq.s32.totalorder %v1485_v16, %v3495_v28  ;;  %v2169_v16 = vld [vmem:[%s947_s5 + $0x8] sm:$0xff] }
 0x258   : > { %v1140_v25 = vmul.f32 %v2849_v15, %v1132_v20  ;;  %2975 = vmatprep.mubr.msk.f32.mxu1 %vm1105_vm1, %v1147_v21  ;;  %v3281_v20 = vmov -1e+30  }
 0x25a   : > { %v1148_v26 = vadd.f32 %v2850_v17, %v1140_v25  ;;  %v1487_v17 = vand.u32 7, %v3499_v29 }
 0x25c   : > { %2976 = vmatmul.mubr.msk.f32.vlgmr.msra.gmra.mrb[0].mxu1 %vm1105_vm1, %v1148_v26  ;;  %v3164_v33 = vpack.c.bf16 %v1148_v26, %v1147_v21  ;;  %vm1488_vm5 = vcmp.lt.s32.totalorder %v1487_v17, 5 }
 0x25d   : > { %3158 = vmatpush3.bf16.msra.mxu1 %v3155_v6  ;;  %2986 = vmatprep.mubr.msk.f32.mxu1 %vm1105_vm1, %v1147_v21  ;;  %vm1489_vm6 = vmand %vm1486_vm3, %vm1488_vm5 }
 0x25e   : > { %3160 = vmatprep.subr.bf16.mxu1 %v3159_v27  ;;  %v3602_v21 = vsel %vm1489_vm6, 0.0, %v3281_v20  ;;  %v2170_v20 = vld [vmem:[%s947_s5 + $0x10] sm:$0xff] }
 0x261   : > { %3162 = vmatpush3.bf16.msra.mxu1 %v3159_v27 }
 0x262   : > { %3163 = vmatprep.subr.bf16.mxu1 %v3278_v0 }
 0x264   : > { %2987 = vmatmul.mubr.msk.f32.vlgmr.msra.gmra.mrb[2].mxu1 %vm1105_vm1, %v1148_v26 }
 0x265   : > { %3165 = vmatpush3.bf16.msra.mxu1 %v3164_v33  ;;  %2993 = vmatprep.mubr.msk.f32.mxu1 %vm3279_vm2, %v3280_v7 }
 0x266   : > { %3166 = vmatprep.subr.bf16.mxu1 %v3278_v0 }
 0x268   : > { %2994 = vmatmul.mubr.msk.f32.vlgmr.msra.gmra.mrb[4].mxu1 %vm1327_vm4, %v3512_v34 }
 0x269   : > { %3168 = vmatpush3.bf16.msra.mxu1 %v3167_v35  ;;  %3004 = vmatprep.mubr.msk.f32.mxu1 %vm3279_vm2, %v3280_v7 }
 0x26a   : > { %3169 = vmatprep.subr.bf16.mxu1 %v3278_v0 }
 0x26d   : > { %3171 = vmatpush3.bf16.msra.mxu1 %v3170_v38 }
 0x26e   : > { %3172 = vmatprep.subr.bf16.mxu1 %v3278_v0 }
 0x32f   : > { %v2977_v40 = vpop.f32.mrb[0].mxu1 }
 0x330   : > { %v1238_v41 = vadd.f32 %v2977_v40, %v2851_v39  ;;  %v1232_v42 = vpop.f32.mrb[1].mxu1 }
 0x331   : > { %v1233_v44 = vadd.f32 %v2851_v39, %v1232_v42 }
 0x333   : > { %v3541_v46 = vpack.c.bf16 %v1238_v41, %v1233_v44 }
 0x335   : > { %3189 = vmatpush3.bf16.xpose.msk.msra.mxu0 %vm3531_vm9, %v3541_v46 }
 0x336   : > { %3190 = vmatprep.subr.bf16.mxu0 %v3278_v0 }
 0x337   : > { %v2988_v49 = vpop.f32.mrb[2].mxu1 }
 0x338   : > { %v1324_v54 = vadd.f32 %v2988_v49, %v2854_v47  ;;  %v1318_v55 = vpop.f32.mrb[3].mxu1 }
 0x339   : > { %v1319_v56 = vadd.f32 %v2854_v47, %v1318_v55 }
 0x33a   : > { %v3554_v57 = vmul.f32 %v2860_v50, %v1324_v54  ;;  %v1685_v58 = vmul.f32 %v2864_v51, %v1324_v54  ;;  %v1925_v59 = vmul.f32 %v2870_v52, %v1324_v54  ;;  %v3557_v60 = vmul.f32 %v3552_v53, %v1324_v54 }
 0x33b   : > { %v3559_v61 = vmul.f32 %v2860_v50, %v1319_v56  ;;  %v1684_v62 = vmul.f32 %v2864_v51, %v1319_v56  ;;  %v1924_v63 = vmul.f32 %v2870_v52, %v1319_v56  ;;  %v3562_v1 = vmul.f32 %v3552_v53, %v1319_v56  ;;  %v1397_v2 = vpop.f32.mrb[4].mxu1 }
 0x33c   : > { %v2995_v3 = vpop.f32.mrb[5].mxu1  ;;  %3005 = vmatmul.mubr.msk.f32.vlgmr.msra.gmra.mrb[6].mxu1 %vm1105_vm1, %v1397_v2 }
 0x33d   : > { %3175 = vmatpush3.bf16.xpose.msk.msra.mxu1 %vm3531_vm9, %v3541_v46  ;;  %3011 = vmatprep.mubr.msk.f32.mxu1 %vm3279_vm2, %v3280_v7  ;;  %v3191_v4 = vpack.c.bf16 %v1925_v59, %v1924_v63  ;;  %v3181_v5 = vpack.c.bf16 %v1685_v58, %v1684_v62  ;;  %v3184_v6 = vpack.c.bf16 %v3554_v57, %v3559_v61 }
 0x33e   : > { %3176 = vmatprep.subr.bf16.mxu1 %v3278_v0  ;;  %v3198_v8 = vpack.c.bf16 %v3557_v60, %v3562_v1  ;;  %v3207_v59 = vpack.c.bf16 %v3468_v48, %v3464_v43 }
 0x40f   : > { %v1481_v10 = vpop.f32.mrb[6].mxu1 }
 0x410   : > { %v3579_v11 = vadd.f32 %v2858_v9, %v1481_v10  ;;  %v3006_v12 = vpop.f32.mrb[7].mxu1 }
 0x412   : > { %v1496_v13 = vmul.f32 %v2860_v50, %v3579_v11  ;;  %v1837_v14 = vmul.f32 %v2870_v52, %v3579_v11  ;;  %v1597_v15 = vmul.f32 %v2864_v51, %v3579_v11  ;;  %v2005_v58 = vmul.f32 %v3552_v53, %v3579_v11 }
 0x414   : > { %3012 = vmatmul.mubr.msk.f32.vlgmr.msra.gmra.mrb[8].mxu1 %vm1105_vm1, %v1496_v13  ;;  %3040 = vmatmul.mubr.msk.f32.vlgmr.msra.gmra.mrb[4].mxu0 %vm1105_vm1, %v1837_v14 }
 0x415   : > { %3179 = vmatpush3.bf16.xpose.msk.msra.mxu1 %vm3531_vm9, %v3541_v46  ;;  %3192 = vmatpush3.bf16.msra.mxu0 %v3191_v4 }
 0x416   : > { %3018 = vmatprep.mubr.msk.f32.mxu1 %vm3279_vm2, %v3280_v7  ;;  %3180 = vmatprep.subr.bf16.mxu1 %v3278_v0 }
 0x417   : > { %3046 = vmatprep.mubr.msk.f32.mxu0 %vm3279_vm2, %v3280_v7  ;;  %3193 = vmatprep.subr.bf16.mxu0 %v3278_v0 }
 0x41c   : > { %3019 = vmatmul.mubr.msk.f32.vlgmr.msra.gmra.mrb[10].mxu1 %vm1105_vm1, %v1597_v15  ;;  %v2168_v15 = vld [vmem:[%s947_s5] sm:$0xff] }
 0x41d   : > { %3182 = vmatpush3.bf16.msra.mxu1 %v3181_v5  ;;  %3025 = vmatprep.mubr.msk.f32.mxu1 %vm3279_vm2, %v3280_v7 }
 0x41e   : > { %3183 = vmatprep.subr.bf16.mxu1 %v3278_v0 }
 0x4e7   : > { %v1572_v18 = vpop.f32.mrb[8].mxu1  ;;  %v1907_v19 = vpop.f32.mrb[4].mxu0 }
 0x4e8   : > { %v1911_v22 = vmul.f32 0.35355338, %v1907_v19  ;;  %v3013_v23 = vpop.f32.mrb[9].mxu1  ;;  %v3041_v24 = vpop.f32.mrb[5].mxu0  ;;  %v1576_v39 = vmul.f32 0.35355338, %v1572_v18  ;;  %v3201_v18 = vpack.c.bf16 %v2169_v16, %v2168_v15 }
 0x4ea   : > { %v1912_v25 = vadd.f32 %v1911_v22, %v3602_v21  ;;  %v1577_v42 = vadd.f32 %v1576_v39, %v3602_v21  ;;  %v2353_v39 = vld [vmem:[%s961_s3] sm:$0xff] }
 0x4ec   : > { %v1913_v26 = vsel %vm1578_vm7, %v1912_v25, -inf  ;;  %v1579_v44 = vsel %vm1578_vm7, %v1577_v42, -inf }
 0x4ed   : > { %1914 = vmax.xlane.f32.xlu0 %v1913_v26 }
 0x4ef   : > { %v1667_v27 = vpop.f32.mrb[10].mxu1 }
 0x4f0   : > { %v1671_v29 = vmul.f32 0.35355338, %v1667_v27  ;;  %v3020_v30 = vpop.f32.mrb[11].mxu1 }
 0x4f1   : > { %v2882_v30 = vld [vmem:[%s950_s1] ss:$0 sm:$0xff] }
 0x4f2   : > { %v1672_v28 = vadd.f32 %v1671_v29, %v3602_v21 }
 0x4f4   : > { %v1673_v31 = vsel %vm1578_vm7, %v1672_v28, -inf }
 0x4f5   : > { %1674 = vmax.xlane.f32.xlu0 %v1673_v31 }
 0x57a   : > { %v1915_v32 = vpop.xlane.xlu0 %1914 }
 0x57b   : > { %v1916_v33 = vsub.f32 %v1912_v25, %v1915_v32 }
 0x57d   : > { %v1917_v35 = vmul.f32 1.442695, %v1916_v33 }
 0x57f   : > { %3248 = vpow2.f32 %v1917_v35 }
 0x582   : > { %v1675_v36 = vpop.xlane.xlu0 %1674 }
 0x583   : > { %v1676_v37 = vsub.f32 %v1672_v28, %v1675_v36 }
 0x585   : > { %v1677_v38 = vmul.f32 1.442695, %v1676_v37 }
 0x587   : > { %3250 = vpow2.f32 %v1677_v38 }
 0x589   : > { %v3249_v40 = vpop.eup %3248 }
 0x58a   : > { %v1919_v41 = vsel %vm1578_vm7, %v3249_v40, 0.0 }
 0x58b   : > { %1920 = vadd.xlane.f32.xlu1 %v1919_v41 }
 0x58f   : > { %1580 = vmax.xlane.f32.xlu1 %v1579_v44  ;;  %v2356_v44 = vld [vmem:[%s961_s3 + $0x18] sm:$0xff] }
 0x591   : > { %v3251_v47 = vpop.eup %3250 }
 0x592   : > { %v1679_v49 = vsel %vm1578_vm7, %v3251_v47, 0.0 }
 0x593   : > { %1680 = vadd.xlane.f32.xlu1 %v1679_v49 }
 0x618   : > { %v1921_v50 = vpop.xlane.xlu1 %1920 }
 0x619   : > { %3252 = vrcp.f32 %v1921_v50 }
 0x61c   : > { %v1581_v51 = vpop.xlane.xlu1 %1580 }
 0x61d   : > { %v1582_v43 = vsub.f32 %v1577_v42, %v1581_v51  ;;  %v2355_v42 = vld [vmem:[%s961_s3 + $0x10] sm:$0xff] }
 0x61f   : > { %v1583_v48 = vmul.f32 1.442695, %v1582_v43 }
 0x620   : > { %v1681_v52 = vpop.xlane.xlu1 %1680 }
 0x621   : > { %3254 = vrcp.f32 %v1681_v52 }
 0x622   : > { %3256 = vpow2.f32 %v1583_v48 }
 0x623   : > { %v3253_v54 = vpop.eup %3252 }
 0x624   : > { %v1923_v55 = vmul.f32 %v3253_v54, %v3249_v40  ;;  %v2354_v40 = vld [vmem:[%s961_s3 + $0x8] sm:$0xff]  ;;  %v2883_v54 = vld [vmem:[%s953_s0] ss:$0 sm:$0xff]  ;;  %s964_s3 = scalar_lea.vmem %s3736_s16, %s3757_s25  ;;  %s972_s0 = scalar_lea.vmem %s3738_s18, %s3757_s25 }
 0x625   : > { %v3210_v41 = vpack.c.bf16 %v2354_v40, %v2353_v39 }
 0x626   : > { %3047 = vmatmul.mubr.msk.f32.vlgmr.msra.gmra.mrb[6].mxu0 %vm1327_vm4, %v1923_v55 }
 0x627   : > { %3196 = vmatpush3.bf16.xpose.msk.msra.mxu0 %vm3531_vm9, %v3541_v46  ;;  %3053 = vmatprep.mubr.msk.f32.mxu0 %vm3279_vm2, %v3280_v7 }
 0x628   : > { %3206 = vmatprep.subr.bf16.mxu0 %v3278_v0 }
 0x62b   : > { %v3255_v56 = vpop.eup %3254 }
 0x62c   : > { %v1683_v62 = vmul.f32 %v3255_v56, %v3251_v47  ;;  %v3257_v3 = vpop.eup %3256  ;;  %v3213_v47 = vpack.c.bf16 %v2356_v44, %v2355_v42  ;;  %v2884_v56 = vld [vmem:[%s956_s30] ss:$0 sm:$0xff]  ;;  %s975_s30 = scalar_lea.vmem %s3739_s19, %s3757_s25 }
 0x62e   : > { %3054 = vmatmul.mubr.msk.f32.vlgmr.msra.gmra.mrb[8].mxu0 %vm1105_vm1, %v2005_v58  ;;  %3026 = vmatmul.mubr.msk.f32.vlgmr.msra.gmra.mrb[12].mxu1 %vm1327_vm4, %v1683_v62 }
 0x62f   : > { %3208 = vmatpush3.bf16.msra.mxu0 %v3207_v59  ;;  %3185 = vmatpush3.bf16.msra.mxu1 %v3184_v6 }
 0x630   : > { %3032 = vmatprep.mubr.msk.f32.mxu1 %vm3279_vm2, %v3280_v7  ;;  %3197 = vmatprep.subr.bf16.mxu1 %v3278_v0 }
 0x631   : > { %3078 = vmatprep.mubr.msk.f32.mxu0 %vm3279_vm2, %v3280_v7  ;;  %3209 = vmatprep.subr.bf16.mxu0 %v3278_v0 }
 0x632   : > { %3079 = vmatmul.mubr.msk.f32.vlgmr.msra.gmra.mrb[10].mxu0 %vm1327_vm4, %v3512_v34  ;;  %v1585_v34 = vsel %vm1578_vm7, %v3257_v3, 0.0 }
 0x633   : > { %3089 = vmatprep.mubr.msk.f32.mxu0 %vm3279_vm2, %v3280_v7  ;;  %3211 = vmatpush3.bf16.msra.mxu0 %v3210_v41 }
 0x634   : > { %3212 = vmatprep.subr.bf16.mxu0 %v3278_v0 }
 0x637   : > { %3214 = vmatpush3.bf16.msra.mxu0 %v3213_v47 }
 0x6f9   : > { %v1995_v45 = vpop.f32.mrb[6].mxu0 }
 0x6fa   : > { %v3048_v46 = vpop.f32.mrb[7].mxu0 }
 0x701   : > { %v2075_v53 = vpop.f32.mrb[8].mxu0 }
 0x702   : > { %v2079_v57 = vmul.f32 0.35355338, %v2075_v53  ;;  %v3055_v61 = vpop.f32.mrb[9].mxu0 }
 0x704   : > { %v2080_v63 = vadd.f32 %v2079_v57, %v3602_v21  ;;  %v2171_v21 = vld [vmem:[%s947_s5 + $0x18] sm:$0xff]  ;;  %s2900_s5 = sshll.u32 %s3757_s25, 6 }
 0x705   : > { %v3204_v22 = vpack.c.bf16 %v2171_v21, %v2170_v20  ;;  %v2311_v26 = vpop.f32.mrb[10].mxu0  ;;  %s969_s1 = scalar_lea.vmem %s3737_s17, %s2900_s5 }
 0x706   : > { %v2081_v2 = vsel %vm1578_vm7, %v2080_v63, -inf  ;;  %v3080_v27 = vpop.f32.mrb[11].mxu0  ;;  %v2446_v62 = vld [vmem:[%s969_s1] sm:$0xff]  ;;  %v2447_v43 = vld [vmem:[%s969_s1 + $0x8] sm:$0xff]  ;;  %v2449_v46 = vld [vmem:[%s969_s1 + $0x18] sm:$0xff] }
 0x707   : > { %2082 = vmax.xlane.f32.xlu0 %v2081_v2  ;;  %v3216_v48 = vpack.c.bf16 %v2447_v43, %v2446_v62  ;;  %v2450_v57 = vld [vmem:[%s969_s1 + $0x20] sm:$0xff]  ;;  %v2451_v61 = vld [vmem:[%s969_s1 + $0x28] sm:$0xff]  ;;  %v2452_v2 = vld [vmem:[%s969_s1 + $0x30] sm:$0xff] }
 0x70b   : > { %1586 = vadd.xlane.f32.xlu0 %v1585_v34 }
 0x794   : > { %v2083_v4 = vpop.xlane.xlu0 %2082 }
 0x795   : > { %v2084_v5 = vsub.f32 %v2080_v63, %v2083_v4  ;;  %v3222_v63 = vpack.c.bf16 %v2451_v61, %v2450_v57  ;;  %v2885_v4 = vld [vmem:[%s964_s3] ss:$0 sm:$0xff] }
 0x797   : > { %v2085_v6 = vmul.f32 1.442695, %v2084_v5 }
 0x798   : > { %v1587_v9 = vpop.xlane.xlu0 %1586 }
 0x799   : > { %3258 = vpow2.f32 %v2085_v6 }
 0x79a   : > { %3260 = vrcp.f32 %v1587_v9 }
 0x7a3   : > { %v3259_v10 = vpop.eup %3258 }
 0x7a4   : > { %v3261_v11 = vpop.eup %3260  ;;  %v2087_v12 = vsel %vm1578_vm7, %v3259_v10, 0.0 }
 0x7a5   : > { %v1589_v13 = vmul.f32 %v3261_v11, %v3257_v3  ;;  %2088 = vadd.xlane.f32.xlu1 %v2087_v12  ;;  %v2453_v3 = vld [vmem:[%s969_s1 + $0x38] sm:$0xff] }
 0x7a6   : > { %v3225_v34 = vpack.c.bf16 %v2453_v3, %v2452_v2 }
 0x7a7   : > { %3033 = vmatmul.mubr.msk.f32.vlgmr.msra.gmra.mrb[12].mxu1 %vm1327_vm4, %v1589_v13 }
 0x7a8   : > { %3199 = vmatpush3.bf16.msra.mxu1 %v3198_v8  ;;  %3060 = vmatprep.mubr.msk.f32.mxu1 %vm3279_vm2, %v3280_v7 }
 0x7a9   : > { %3200 = vmatprep.subr.bf16.mxu1 %v3278_v0 }
 0x832   : > { %v2089_v14 = vpop.xlane.xlu1 %2088 }
 0x833   : > { %3262 = vrcp.f32 %v2089_v14 }
 0x83d   : > { %v3263_v17 = vpop.eup %3262 }
 0x83e   : > { %v2091_v19 = vmul.f32 %v3263_v17, %v3259_v10 }
 0x840   : > { %3061 = vmatmul.mubr.msk.f32.vlgmr.msra.gmra.mrb[14].mxu1 %vm1327_vm4, %v2091_v19  ;;  %vm2325_vm4 = vcmask 254976   ;;  %v2888_v19 = vld [vmem:[%s972_s0] ss:$0 sm:$0xff] }
 0x841   : > { %3202 = vmatpush3.bf16.msra.mxu1 %v3201_v18  ;;  %3071 = vmatprep.mubr.msk.f32.mxu1 %vm3279_vm2, %v3280_v7 }
 0x842   : > { %3203 = vmatprep.subr.bf16.mxu1 %v3278_v0 }
 0x845   : > { %3205 = vmatpush3.bf16.msra.mxu1 %v3204_v22 }
 0x846   : > { %3215 = vmatprep.subr.bf16.mxu1 %v3278_v0 }
 0x87a   : > { %v1828_v60 = vpop.f32.mrb[12].mxu1 }
 0x87b   : > { %v3227_v1 = vadd.f32 %v1995_v45, %v1828_v60  ;;  %v3034_v8 = vpop.f32.mrb[13].mxu1  ;;  %v2448_v45 = vld [vmem:[%s969_s1 + $0x10] sm:$0xff]  ;;  %s2845_s1 = sshll.u32 %s3757_s25, 1 }
 0x87c   : > { %v3219_v53 = vpack.c.bf16 %v2449_v46, %v2448_v45  ;;  %s982_s3 = scalar_lea.vmem %s3741_s21, %s2845_s1 }
 0x913   : > { %v2163_v23 = vpop.f32.mrb[14].mxu1 }
 0x914   : > { %v3228_v24 = vadd.f32 %v3227_v1, %v2163_v23  ;;  %v3062_v25 = vpop.f32.mrb[15].mxu1 }
 0x916   : > { %3072 = vmatmul.mubr.msk.f32.vlgmr.msra.gmra.mrb[16].mxu1 %vm1105_vm1, %v3228_v24 }
 0x917   : > { %3108 = vmatprep.mubr.msk.f32.mxu1 %vm3279_vm2, %v3280_v7  ;;  %3217 = vmatpush3.bf16.msra.mxu1 %v3216_v48 }
 0x918   : > { %3218 = vmatprep.subr.bf16.mxu1 %v3278_v0 }
 0x91b   : > { %3220 = vmatpush3.bf16.msra.mxu1 %v3219_v53 }
 0x91c   : > { %3221 = vmatprep.subr.bf16.mxu1 %v3278_v0 }
 0x91f   : > { %3223 = vmatpush3.bf16.msra.mxu1 %v3222_v63 }
 0x920   : > { %3224 = vmatprep.subr.bf16.mxu1 %v3278_v0 }
 0x923   : > { %3226 = vmatpush3.bf16.msra.mxu1 %v3225_v34 }
 0x9e9   : > { %v2241_v29 = vpop.f32.mrb[16].mxu1 }
 0x9ea   : > { %v2312_v28 = vadd.f32 %v2311_v26, %v2241_v29  ;;  %v3073_v31 = vpop.f32.mrb[17].mxu1 }
 0x9ec   : > { %v3665_v32 = vadd.f32 %v2882_v30, %v2312_v28  ;;  %v2889_v28 = vld [vmem:[%s975_s30] ss:$0 sm:$0xff] }
 0x9ee   : > { %v2326_v33 = vsel %vm2325_vm4, %v3665_v32, 0.0 }
 0x9ef   : > { %2327 = vadd.xlane.f32.xlu0 %v2326_v33 }
 0xa7c   : > { %v2328_v35 = vpop.xlane.xlu0 %2327 }
 0xa7d   : > { %v2329_v7 = vmul.f32 0.03125, %v2328_v35 }
 0xa7f   : > { %v2330_v36 = vsub.f32 %v3665_v32, %v2329_v7 }
 0xa81   : > { %v2331_v37 = vmul.f32 %v2330_v36, %v2330_v36 }
 0xa83   : > { %v2332_v38 = vsel %vm2325_vm4, %v2331_v37, 0.0 }
 0xa84   : > { %2333 = vadd.xlane.f32.xlu1 %v2332_v38 }
 0xb11   : > { %v2334_v49 = vpop.xlane.xlu1 %2333 }
 0xb12   : > { %v2335_v50 = vmul.f32 0.03125, %v2334_v49 }
 0xb14   : > { %v2336_v51 = vadd.f32 1e-06, %v2335_v50 }
 0xb16   : > { %3264 = vrsqrt.f32 %v2336_v51 }
 0xb20   : > { %v3265_v52 = vpop.eup %3264 }
 0xb21   : > { %v2338_v55 = vmul.f32 %v3265_v52, %v2330_v36 }
 0xb23   : > { %v2345_v58 = vmul.f32 %v2883_v54, %v2338_v55 }
 0xb25   : > { %v2352_v59 = vadd.f32 %v2884_v56, %v2345_v58 }
 0xb27   : > { %3090 = vmatmul.mubr.msk.f32.vlgmr.msra.gmra.mrb[12].mxu0 %vm1105_vm1, %v2352_v59 }
 0xbfa   : > { %v2433_v5 = vpop.f32.mrb[12].mxu0 }
 0xbfb   : > { %v2434_v6 = vadd.f32 %v2885_v4, %v2433_v5  ;;  %v3091_v9 = vpop.f32.mrb[13].mxu0 }
 0xbfd   : > { %v2437_v10 = vmul.f32 %v2434_v6, %v2434_v6 }
 0xbff   : > { %v2438_v11 = vmul.f32 %v2437_v10, %v2434_v6 }
 0xc01   : > { %v2439_v12 = vmul.f32 0.044715, %v2438_v11 }
 0xc03   : > { %v2440_v13 = vadd.f32 %v2439_v12, %v2434_v6 }
 0xc05   : > { %v2441_v14 = vmul.f32 0.7978846, %v2440_v13 }
 0xc07   : > { %3266 = vtanh.f32 %v2441_v14 }
 0xc11   : > { %v3267_v0 = vpop.eup %3266 }
 0xc12   : > { %v2443_v15 = vadd.f32 1.0, %v3267_v0 }
 0xc14   : > { %v2444_v16 = vmul.f32 0.5, %v2443_v15 }
 0xc16   : > { %v2445_v17 = vmul.f32 %v2444_v16, %v2434_v6 }
 0xc18   : > { %3109 = vmatmul.mubr.msk.f32.vlgmr.msra.gmra.mrb[18].mxu1 %vm1013_vm0, %v2445_v17 }
 0xceb   : > { %v2523_v18 = vpop.f32.mrb[18].mxu1 }
 0xcec   : > { %v2527_v60 = vadd.f32 %v2523_v18, %v3665_v32  ;;  %v3110_v1 = vpop.f32.mrb[19].mxu1  ;;  %v2890_v32 = vld [vmem:[%s978_s23] ss:$0 sm:$0xff] }
 0xcee   : > { %v2535_v8 = vadd.f32 %v2888_v19, %v2527_v60 }
 0xcf0   : > { %v2538_v20 = vsel %vm2325_vm4, %v2535_v8, 0.0 }
 0xcf1   : > { %2539 = vadd.xlane.f32.xlu0 %v2538_v20 }
 0xd7e   : > { %v2540_v21 = vpop.xlane.xlu0 %2539 }
 0xd7f   : > { %v2541_v22 = vmul.f32 0.03125, %v2540_v21 }
 0xd81   : > { %v2542_v23 = vsub.f32 %v2535_v8, %v2541_v22 }
 0xd83   : > { %v2543_v24 = vmul.f32 %v2542_v23, %v2542_v23 }
 0xd85   : > { %v2544_v25 = vsel %vm2325_vm4, %v2543_v24, 0.0 }
 0xd86   : > { %2545 = vadd.xlane.f32.xlu1 %v2544_v25 }
 0xe13   : > { %v2546_v26 = vpop.xlane.xlu1 %2545 }
 0xe14   : > { %v2547_v27 = vmul.f32 0.03125, %v2546_v26 }
 0xe16   : > { %v2548_v29 = vadd.f32 1e-06, %v2547_v27 }
 0xe18   : > { %3268 = vrsqrt.f32 %v2548_v29 }
 0xe22   : > { %v3269_v30 = vpop.eup %3268 }
 0xe23   : > { %v2550_v31 = vmul.f32 %v3269_v30, %v2542_v23 }
 0xe25   : > { %v2557_v33 = vmul.f32 %v2889_v28, %v2550_v31 }
 0xe27   : > { %v2564_v35 = vadd.f32 %v2890_v32, %v2557_v33 }
 0xe29   : > { %2565 = vst.msk [vmem:[%s982_s3] sm:$0x3] %vm2325_vm4, %v2564_v35 }
 0xe2a PF: > { %s31_s2 = sadd.s32 1, %s3276_s2  }
 0xe2b   : > { %p28_p4 = scmp.ge.s32.totalorder %s31_s2, 5  }
 0xe2d   :  { %30 = sbr.rel (!%p28_p4) target bundleno = 7 (0x7), region = 194 }

</bundles_post_ra>
